<compile_context>
chip_gen: v5e
topology: v5e:2x2
jax: 0.10.0
libtpu: 0.0.40
codegen_flags: <defaults>
</compile_context>

<pallas_src>
import functools
import math

import jax
import jax.numpy as jnp
from jax.experimental import pallas as pl
from jax.experimental.pallas import tpu as pltpu


# ------------------------------ tiling helpers ------------------------------

_LANE = 128
_MAX_TILE = 2048                           # largest lane tile we ever use
_VMEM_BLOCK_BUDGET = 20 * 1024 * 1024      # double-buffered blocks + temps / kernel
_VMEM_LIMIT = 48 * 1024 * 1024             # explicit scoped-VMEM limit: above every
                                           # default (16/32 MiB), below v7x's 64 MiB


def _cdiv(a, b):
    return -(-a // b)


def _compiler_params():
    return pltpu.CompilerParams(
        dimension_semantics=("parallel", "parallel"),
        vmem_limit_bytes=_VMEM_LIMIT)


def _pick_pixel_tile(p, n, bytes_per_lane):
    """Lane tile for a flattened pixel axis of length p.

    Returns tp that is a multiple of 128 (ragged last block allowed: OOB lanes
    are elementwise garbage that the boundary-block writeback drops) or p itself
    when p < 128 (full-extent block).  Sized so double-buffered blocks plus
    in-kernel temporaries stay under _VMEM_BLOCK_BUDGET, then shrunk (never
    below 128) until the (n, nb) grid exposes >= 4 blocks so both v7x
    TensorCores get work.
    """
    if p <= _LANE:
        return p
    cap = max(_LANE, (_VMEM_BLOCK_BUDGET // max(bytes_per_lane, 1)) // _LANE * _LANE)
    tp = min(_MAX_TILE, cap, (p // _LANE) * _LANE)
    while tp > _LANE and n * _cdiv(p, tp) < 4:
        tp = max(_LANE, (tp // 2) // _LANE * _LANE)
    return tp


# ----------------------------- Pallas kernels ------------------------------

def _pw_conv_kernel(x_ref, w_ref, shift_ref, o_ref, *, relu):
    # x: [Cin, TP], w: [Cout, Cin] bf16, shift: [Cout, 1] f32.
    x = x_ref[...]
    if x.dtype != jnp.bfloat16:
        x = x.astype(jnp.bfloat16)
    y = jnp.dot(w_ref[...], x, preferred_element_type=jnp.float32)   # [Cout, TP]
    y = y + shift_ref[...]                    # f32 epilogue (lane broadcast)
    if relu:
        y = jnp.maximum(y, 0.0)
    o_ref[...] = y.astype(o_ref.dtype)


def _spectral_conv_kernel(xr_ref, xi_ref, wrr_ref, wri_ref, wir_ref, wii_ref,
                          or_ref, oi_ref):
    # FourierUnit 1x1 conv + ReLU with the (re, im) channel interleave fused in.
    xr = xr_ref[...].astype(jnp.bfloat16)
    xi = xi_ref[...].astype(jnp.bfloat16)
    yr = (jnp.dot(wrr_ref[...], xr, preferred_element_type=jnp.float32)
          + jnp.dot(wri_ref[...], xi, preferred_element_type=jnp.float32))
    yi = (jnp.dot(wir_ref[...], xr, preferred_element_type=jnp.float32)
          + jnp.dot(wii_ref[...], xi, preferred_element_type=jnp.float32))
    or_ref[...] = jnp.maximum(yr, 0.0).astype(or_ref.dtype)
    oi_ref[...] = jnp.maximum(yi, 0.0).astype(oi_ref.dtype)


def _sum3_conv_kernel(x_ref, f_ref, s_ref, w_ref, o_ref, *, img_w, nsrc, dup):
    # x/f: [Cin, TP] f32 blocks covering whole image rows; s: LFU-output block.
    if dup:
        # Rebuild the 2x2-tiled LFU block in VMEM: each half-row is duplicated
        # along W; the H wrap (r % nsrc) covers blocks spanning > H/2 rows.
        w2 = img_w // 2
        rows = x_ref.shape[-1] // img_w
        pieces = []
        for r in range(rows):
            src = (r % nsrc) * w2
            half = s_ref[:, src:src + w2]
            pieces.append(half)
            pieces.append(half)
        xs = jnp.concatenate(pieces, axis=-1)          # [Cin, TP], VMEM-local
    else:
        xs = s_ref[...]
    t = x_ref[...] + f_ref[...] + xs                   # keep the sum in f32
    y = jnp.dot(w_ref[...], t.astype(jnp.bfloat16),
                preferred_element_type=jnp.float32)
    o_ref[...] = y.astype(o_ref.dtype)


# ----------------------------- kernel wrappers ------------------------------

def pointwise_conv(x, w, shift, relu=True, out_dtype=None):
    """1x1 conv (bias=False) + per-channel shift + optional ReLU, NC* layout."""
    n, cin = x.shape[:2]
    spatial = x.shape[2:]
    p = math.prod(spatial)
    cout = w.shape[0]
    out_dtype = out_dtype if out_dtype is not None else x.dtype

    # per-pixel bytes: double-buffered in/out blocks + bf16 cast + f32 matmul temp
    bpl = 2 * 4 * (cin + cout) + 2 * cin + 4 * cout
    tp = _pick_pixel_tile(p, n, bpl)
    nb = _cdiv(p, tp)

    out = pl.pallas_call(
        functools.partial(_pw_conv_kernel, relu=relu),
        out_shape=jax.ShapeDtypeStruct((n, cout, p), out_dtype),
        grid=(n, nb),
        in_specs=[
            pl.BlockSpec((None, cin, tp), lambda b, i: (b, 0, i)),
            pl.BlockSpec((cout, cin), lambda b, i: (0, 0)),
            pl.BlockSpec((cout, 1), lambda b, i: (0, 0)),
        ],
        out_specs=pl.BlockSpec((None, cout, tp), lambda b, i: (b, 0, i)),
        compiler_params=_compiler_params(),
    )(x.reshape(n, cin, p),
      w.astype(jnp.bfloat16),
      shift.reshape(cout, 1).astype(jnp.float32))
    return out.reshape((n, cout) + spatial)


def _split_complex_weight(w):
    """torch FourierUnit weight [2*Cout, 2*Cin] over interleaved (re, im)
    channels -> the four [Cout, Cin] real blocks (rr, ri, ir, ii)."""
    cout, cin = w.shape[0] // 2, w.shape[1] // 2
    w4 = w.reshape(cout, 2, cin, 2)
    return w4[:, 0, :, 0], w4[:, 0, :, 1], w4[:, 1, :, 0], w4[:, 1, :, 1]


def spectral_pointwise_conv(xr, xi, conv_w):
    """FourierUnit spectral 1x1 conv + ReLU with the real/imag pack/unpack fused.

    xr, xi: [N, Cin, H, Wr] f32 (rfft2 real / imag parts).
    conv_w: [2*Cout, 2*Cin] torch-interleaved weight.
    Returns (yr, yi): [N, Cout, H, Wr] f32 each.
    """
    n, cin = xr.shape[:2]
    spatial = xr.shape[2:]
    p = math.prod(spatial)
    cout = conv_w.shape[0] // 2
    wrr, wri, wir, wii = (wk.astype(jnp.bfloat16)
                          for wk in _split_complex_weight(conv_w))

    bpl = 2 * 4 * 2 * (cin + cout) + 2 * 2 * cin + 2 * 4 * cout
    tp = _pick_pixel_tile(p, n, bpl)
    nb = _cdiv(p, tp)

    data_spec = pl.BlockSpec((None, cin, tp), lambda b, i: (b, 0, i))
    wt_spec = pl.BlockSpec((cout, cin), lambda b, i: (0, 0))
    out_spec = pl.BlockSpec((None, cout, tp), lambda b, i: (b, 0, i))

    yr, yi = pl.pallas_call(
        _spectral_conv_kernel,
        out_shape=(jax.ShapeDtypeStruct((n, cout, p), jnp.float32),
                   jax.ShapeDtypeStruct((n, cout, p), jnp.float32)),
        grid=(n, nb),
        in_specs=[data_spec, data_spec, wt_spec, wt_spec, wt_spec, wt_spec],
        out_specs=(out_spec, out_spec),
        compiler_params=_compiler_params(),
    )(xr.reshape(n, cin, p).astype(jnp.float32),
      xi.reshape(n, cin, p).astype(jnp.float32),
      wrr, wri, wir, wii)
    return (yr.reshape((n, cout) + spatial), yi.reshape((n, cout) + spatial))


def sum3_pointwise_conv(x, fu, xs, w):
    """conv2(x + fu + tile2x2(xs)) with a 1x1 conv (bias=False).

    x, fu: [N, C, H, W] f32; xs: [N, C, H/2, W/2] f32 (LFU output, NOT tiled).
    The 2x2 spatial tile of xs is realized with a modular index_map along H and
    an in-VMEM lane duplication along W; it never touches HBM.
    """
    n, c, h, wd = x.shape
    cout = w.shape[0]
    h2, w2 = h // 2, wd // 2
    hw = h * wd

    # per-output-pixel bytes: double-buffered x/fu/out/xs blocks + kernel temps
    bpl = (2 * 4 * (2 * c + cout)          # x, fu, out blocks (f32, 2 buffers)
           + 2 * 4 * (c // 2 + 1)          # xs block (half width, 2 buffers)
           + 4 * c + 2 * c + 4 * cout)     # xs_dup + sum (f32), bf16 cast, f32 y
    max_tp = max(wd, _VMEM_BLOCK_BUDGET // max(bpl, 1))

    # rows-per-block candidates: whole image, or divisors of H/2 so a row-block
    # never straddles the 2x tile boundary and xs maps to one contiguous block.
    valid = []
    for r in [h] + sorted((d for d in range(1, h2 + 1) if h2 % d == 0),
                          reverse=True):
        tp = r * wd
        if tp > max_tp:
            continue
        if r == h:
            valid.append(r)                               # full-extent blocks
        elif tp % _LANE == 0 and ((r * w2) % _LANE == 0 or r == h2):
            valid.append(r)

    if valid:
        pref = [r for r in valid if n * (h // r) >= 4]    # feed both v7x cores
        rpb = pref[0] if pref else valid[0]
        tp = rpb * wd
        nb = h // rpb
        nsrc = min(rpb, h2)
        nbs = max(h2 // rpb, 1)
        xs_in = xs.reshape(n, c, h2 * w2)
        s_spec = pl.BlockSpec((None, c, nsrc * w2),
                              lambda b, i: (b, 0, i % nbs))
        dup = True
    else:
        # Awkward (large, misaligned) shapes: materialize the 2x2 tile in XLA
        # once and fall back to plain ragged lane tiling.  Correct + VMEM-safe.
        xs_in = jnp.tile(xs, (1, 1, 2, 2)).reshape(n, c, hw)
        tp = _pick_pixel_tile(hw, n, bpl)
        nb = _cdiv(hw, tp)
        nsrc = 1
        s_spec = pl.BlockSpec((None, c, tp), lambda b, i: (b, 0, i))
        dup = False

    out = pl.pallas_call(
        functools.partial(_sum3_conv_kernel, img_w=wd, nsrc=nsrc, dup=dup),
        out_shape=jax.ShapeDtypeStruct((n, cout, hw), x.dtype),
        grid=(n, nb),
        in_specs=[
            pl.BlockSpec((None, c, tp), lambda b, i: (b, 0, i)),
            pl.BlockSpec((None, c, tp), lambda b, i: (b, 0, i)),
            s_spec,
            pl.BlockSpec((cout, c), lambda b, i: (0, 0)),
        ],
        out_specs=pl.BlockSpec((None, cout, tp), lambda b, i: (b, 0, i)),
        compiler_params=_compiler_params(),
    )(x.reshape(n, c, hw), fu.reshape(n, c, hw), xs_in, w.astype(jnp.bfloat16))
    return out.reshape(n, cout, h, wd)


# ------------------------------ FourierUnit --------------------------------

def fourier_unit(x, conv_w):
    """FourierUnit forward (groups=1, no SE / pos-enc / ffc3d), NCHW f32.

    FourierUnit.bn is defined in __init__ but never applied in forward, so it
    is intentionally omitted here as well.
    """
    # TODO(synk): rfft2/irfft2 have no Pallas primitive; they run as XLA FFT
    # custom calls.  Only the spectral 1x1 conv (+ReLU) runs in Pallas, with the
    # real/imag interleave/deinterleave folded into the kernel's weights.
    n, c, h, w = x.shape
    ff = jnp.fft.rfft2(x.astype(jnp.float32), axes=(-2, -1), norm="ortho")
    yr, yi = spectral_pointwise_conv(jnp.real(ff), jnp.imag(ff), conv_w)
    out = jnp.fft.irfft2(jax.lax.complex(yr, yi), s=(h, w), axes=(-2, -1),
                         norm="ortho")
    return out.astype(jnp.float32)


# --------------------------- SpectralTransform ------------------------------

def spectral_transform(x, params, stride=1):
    """SpectralTransform.forward (enable_lfu path); x is NCHW float32."""
    if stride == 2:
        # TODO(synk): the 2x2 avg-pool stays in XLA; folding it into conv1's
        # BlockSpec is only worthwhile if the stride-2 path is hot.
        n0, c0, h0, w0 = x.shape
        x = x.reshape(n0, c0, h0 // 2, 2, w0 // 2, 2).mean(axis=(3, 5))

    # conv1 + inference BN + ReLU: fold the BN scale into the weight, keep shift.
    eps = 1e-5
    scale = params["bn1_gamma"] / jnp.sqrt(params["bn1_var"] + eps)
    shift = params["bn1_beta"] - params["bn1_mean"] * scale
    w1 = params["conv1_w"] * scale[:, None]
    x = pointwise_conv(x, w1, shift=shift, relu=True, out_dtype=jnp.float32)

    output = fourier_unit(x, params["fu_conv_w"])

    n, c, h, w = x.shape
    # LFU branch: fold 2x2 spatial blocks of the first c//4 channels into channels.
    xs = x[:, : c // 4]
    xs = jnp.concatenate(jnp.split(xs, 2, axis=2), axis=1)   # [n, c//2, h/2, w]
    xs = jnp.concatenate(jnp.split(xs, 2, axis=3), axis=1)   # [n, c,    h/2, w/2]
    xs = fourier_unit(xs, params["lfu_conv_w"])              # [n, c,    h/2, w/2]

    # conv2 over (x + fu + 2x2-tiled lfu); the tiling stays in VMEM / index_maps.
    return sum3_pointwise_conv(x, output, xs, params["conv2_w"])


# ------------------------- pure-JAX reference check -------------------------

def _ref_pw(x, w, scale=None, shift=None, relu=False):
    cout = w.shape[0]
    if scale is None:
        scale = jnp.ones((cout,), x.dtype)
    if shift is None:
        shift = jnp.zeros((cout,), x.dtype)
    y = jnp.einsum("nchw,oc->nohw", x, w)
    y = y * scale[None, :, None, None] + shift[None, :, None, None]
    return jnp.maximum(y, 0.0) if relu else y


def _ref_fourier_unit(x, conv_w):
    n, c, h, w = x.shape
    ffted = jnp.fft.rfft2(x, axes=(-2, -1), norm="ortho")
    wr = ffted.shape[-1]
    f = jnp.stack((ffted.real, ffted.imag), axis=2).reshape(n, c * 2, h, wr)
    f = _ref_pw(f.astype(x.dtype), conv_w, relu=True)
    f = f.reshape(n, c, 2, h, wr)
    fc = jax.lax.complex(f[:, :, 0], f[:, :, 1])
    return jnp.fft.irfft2(fc, s=(h, w), axes=(-2, -1), norm="ortho").astype(x.dtype)


def _ref_spectral_transform(x, params):
    eps = 1e-5
    scale = params["bn1_gamma"] / jnp.sqrt(params["bn1_var"] + eps)
    shift = params["bn1_beta"] - params["bn1_mean"] * scale
    x = _ref_pw(x, params["conv1_w"], scale, shift, relu=True)
    output = _ref_fourier_unit(x, params["fu_conv_w"])
    n, c, h, w = x.shape
    xs = x[:, : c // 4]
    xs = jnp.concatenate(jnp.split(xs, 2, axis=2), axis=1)
    xs = jnp.concatenate(jnp.split(xs, 2, axis=3), axis=1)
    xs = _ref_fourier_unit(xs, params["lfu_conv_w"])
    xs = jnp.tile(xs, (1, 1, 2, 2))
    return jnp.einsum("nchw,oc->nohw", x + output + xs, params["conv2_w"])


# ----------------------------------- main -----------------------------------

def _make_params(key, c_in, c_out):
    c_mid = c_out // 2
    ks = jax.random.split(key, 8)
    return {
        "conv1_w":   0.3 * jax.random.normal(ks[0], (c_mid, c_in), jnp.float32),
        "bn1_gamma": 1.0 + 0.1 * jax.random.normal(ks[1], (c_mid,), jnp.float32),
        "bn1_beta":  0.1 * jax.random.normal(ks[2], (c_mid,), jnp.float32),
        "bn1_mean":  0.1 * jax.random.normal(ks[3], (c_mid,), jnp.float32),
        "bn1_var":   1.0 + 0.1 * jnp.abs(jax.random.normal(ks[4], (c_mid,), jnp.float32)),
        "fu_conv_w":  0.3 * jax.random.normal(ks[5], (2 * c_mid, 2 * c_mid), jnp.float32),
        "lfu_conv_w": 0.3 * jax.random.normal(ks[6], (2 * c_mid, 2 * c_mid), jnp.float32),
        "conv2_w":    0.3 * jax.random.normal(ks[7], (c_out, c_mid), jnp.float32),
    }


if __name__ == "__main__":
    key = jax.random.PRNGKey(0)
    # (N, C_in, C_out, H, W): exercises ragged spectral lane tiles, the sum3
    # case-B in-kernel H wrap (single row-block), and the case-A modular
    # xs index_map with nbs > 1 (multiple row-blocks).
    configs = [
        (2, 4, 8, 16, 16),
        (1, 4, 8, 16, 16),
        (1, 8, 16, 32, 32),
    ]
    fn = jax.jit(spectral_transform)
    for idx, (n, c_in, c_out, h, w) in enumerate(configs):
        kp, kx, key = jax.random.split(key, 3)
        params = _make_params(kp, c_in, c_out)
        x = jax.random.normal(kx, (n, c_in, h, w), jnp.float32)

        out = jax.block_until_ready(fn(x, params))
        assert out.shape == (n, c_out, h, w), (idx, out.shape)

        # bf16 MXU operands vs a pure-f32 reference -> bf16-appropriate tolerance.
        ref = _ref_spectral_transform(x, params)
        err = float(jnp.max(jnp.abs(out - ref)))
        assert jnp.allclose(out, ref, rtol=5e-2, atol=5e-2), (idx, err)

    print("KERNEL_OK")
</pallas_src>

<mosaic_0001>
module attributes {stable_mosaic.version = 11 : i64} {
  func.func @_pw_conv_kernel(%arg0: i32, %arg1: i32, %arg2: memref<1x4x128xf32, #tpu.memory_space<vmem>>, %arg3: memref<4x4xbf16, #tpu.memory_space<vmem>>, %arg4: memref<4x1xf32, #tpu.memory_space<vmem>>, %arg5: memref<1x4x128xf32, #tpu.memory_space<vmem>>) attributes {dimension_semantics = [#tpu.dimension_semantics<parallel>, #tpu.dimension_semantics<parallel>], iteration_bounds = array<i64: 2, 2>, scalar_prefetch = 0 : i64, scratch_operands = 0 : i64, tpu.core_type = #tpu.core_type<tc>, window_params = [{transform_indices = @transform_0, window_bounds = array<i64: 1, 4, 128>}, {pipeline_mode = #tpu.pipeline_mode<synchronous>, transform_indices = @transform_1, window_bounds = array<i64: 4, 4>}, {pipeline_mode = #tpu.pipeline_mode<synchronous>, transform_indices = @transform_2, window_bounds = array<i64: 4, 1>}, {transform_indices = @transform_3, window_bounds = array<i64: 1, 4, 128>}]} {
    %c0 = arith.constant 0 : index
    %c0_0 = arith.constant 0 : index
    %c0_1 = arith.constant 0 : index
    %0 = vector.load %arg2[%c0, %c0_0, %c0_1] : memref<1x4x128xf32, #tpu.memory_space<vmem>>, vector<1x4x128xf32>
    %1 = vector.shape_cast %0 : vector<1x4x128xf32> to vector<4x128xf32>
    %2 = arith.truncf %1 : vector<4x128xf32> to vector<4x128xbf16>
    %c0_2 = arith.constant 0 : index
    %c0_3 = arith.constant 0 : index
    %3 = vector.load %arg3[%c0_2, %c0_3] : memref<4x4xbf16, #tpu.memory_space<vmem>>, vector<4x4xbf16>
    %cst = arith.constant dense<0.000000e+00> : vector<4x128xf32>
    %4 = tpu.matmul %3, %2, %cst {dimension_numbers = #tpu.dot_dimension_numbers<[1], [0], [0], [1], [0, 0, 1, 1], [], []>} : vector<4x4xbf16>, vector<4x128xbf16>, vector<4x128xf32> -> vector<4x128xf32>
    %c0_4 = arith.constant 0 : index
    %c0_5 = arith.constant 0 : index
    %5 = vector.load %arg4[%c0_4, %c0_5] : memref<4x1xf32, #tpu.memory_space<vmem>>, vector<4x1xf32>
    %6 = vector.broadcast %5 : vector<4x1xf32> to vector<4x128xf32>
    %7 = arith.addf %4, %6 : vector<4x128xf32>
    %cst_6 = arith.constant 0.000000e+00 : f32
    %8 = vector.broadcast %cst_6 : f32 to vector<4x128xf32>
    %9 = arith.maximumf %7, %8 : vector<4x128xf32>
    %c0_7 = arith.constant 0 : index
    %c0_8 = arith.constant 0 : index
    %c0_9 = arith.constant 0 : index
    %10 = vector.load %arg5[%c0_7, %c0_8, %c0_9] : memref<1x4x128xf32, #tpu.memory_space<vmem>>, vector<1x4x128xf32>
    %11 = vector.shape_cast %10 : vector<1x4x128xf32> to vector<4x128xf32>
    %12 = vector.shape_cast %9 : vector<4x128xf32> to vector<1x4x128xf32>
    tpu.vector_store %arg5[%c0_7, %c0_8, %c0_9], %12 {strides = array<i32>} : memref<1x4x128xf32, #tpu.memory_space<vmem>>, vector<1x4x128xf32>,
    return
  }
  func.func @transform_0(%arg0: i32, %arg1: i32) -> (i32, i32, i32) {
    %c0_i32 = arith.constant 0 : i32
    %c0_i32_0 = arith.constant 0 : i32
    return %arg0, %c0_i32, %arg1 : i32, i32, i32
  }
  func.func @transform_1(%arg0: i32, %arg1: i32) -> (i32, i32) {
    %c0_i32 = arith.constant 0 : i32
    %c0_i32_0 = arith.constant 0 : i32
    %c0_i32_1 = arith.constant 0 : i32
    return %c0_i32, %c0_i32_0 : i32, i32
  }
  func.func @transform_2(%arg0: i32, %arg1: i32) -> (i32, i32) {
    %c0_i32 = arith.constant 0 : i32
    %c0_i32_0 = arith.constant 0 : i32
    %c0_i32_1 = arith.constant 0 : i32
    return %c0_i32, %c0_i32_0 : i32, i32
  }
  func.func @transform_3(%arg0: i32, %arg1: i32) -> (i32, i32, i32) {
    %c0_i32 = arith.constant 0 : i32
    %c0_i32_0 = arith.constant 0 : i32
    return %arg0, %c0_i32, %arg1 : i32, i32, i32
  }
}

module attributes {stable_mosaic.version = 11 : i64} {
  func.func @_spectral_conv_kernel(%arg0: i32, %arg1: i32, %arg2: memref<1x4x40xf32, #tpu.memory_space<vmem>>, %arg3: memref<1x4x40xf32, #tpu.memory_space<vmem>>, %arg4: memref<4x4xbf16, #tpu.memory_space<vmem>>, %arg5: memref<4x4xbf16, #tpu.memory_space<vmem>>, %arg6: memref<4x4xbf16, #tpu.memory_space<vmem>>, %arg7: memref<4x4xbf16, #tpu.memory_space<vmem>>, %arg8: memref<1x4x40xf32, #tpu.memory_space<vmem>>, %arg9: memref<1x4x40xf32, #tpu.memory_space<vmem>>) attributes {dimension_semantics = [#tpu.dimension_semantics<parallel>, #tpu.dimension_semantics<parallel>], iteration_bounds = array<i64: 2, 1>, scalar_prefetch = 0 : i64, scratch_operands = 0 : i64, tpu.core_type = #tpu.core_type<tc>, window_params = [{transform_indices = @transform_0, window_bounds = array<i64: 1, 4, 40>}, {transform_indices = @transform_1, window_bounds = array<i64: 1, 4, 40>}, {pipeline_mode = #tpu.pipeline_mode<synchronous>, transform_indices = @transform_2, window_bounds = array<i64: 4, 4>}, {pipeline_mode = #tpu.pipeline_mode<synchronous>, transform_indices = @transform_3, window_bounds = array<i64: 4, 4>}, {pipeline_mode = #tpu.pipeline_mode<synchronous>, transform_indices = @transform_4, window_bounds = array<i64: 4, 4>}, {pipeline_mode = #tpu.pipeline_mode<synchronous>, transform_indices = @transform_5, window_bounds = array<i64: 4, 4>}, {transform_indices = @transform_6, window_bounds = array<i64: 1, 4, 40>}, {transform_indices = @transform_7, window_bounds = array<i64: 1, 4, 40>}]} {
    %c0 = arith.constant 0 : index
    %c0_0 = arith.constant 0 : index
    %c0_1 = arith.constant 0 : index
    %0 = vector.load %arg2[%c0, %c0_0, %c0_1] : memref<1x4x40xf32, #tpu.memory_space<vmem>>, vector<1x4x40xf32>
    %1 = vector.shape_cast %0 : vector<1x4x40xf32> to vector<4x40xf32>
    %2 = arith.truncf %1 : vector<4x40xf32> to vector<4x40xbf16>
    %c0_2 = arith.constant 0 : index
    %c0_3 = arith.constant 0 : index
    %c0_4 = arith.constant 0 : index
    %3 = vector.load %arg3[%c0_2, %c0_3, %c0_4] : memref<1x4x40xf32, #tpu.memory_space<vmem>>, vector<1x4x40xf32>
    %4 = vector.shape_cast %3 : vector<1x4x40xf32> to vector<4x40xf32>
    %5 = arith.truncf %4 : vector<4x40xf32> to vector<4x40xbf16>
    %c0_5 = arith.constant 0 : index
    %c0_6 = arith.constant 0 : index
    %6 = vector.load %arg4[%c0_5, %c0_6] : memref<4x4xbf16, #tpu.memory_space<vmem>>, vector<4x4xbf16>
    %cst = arith.constant dense<0.000000e+00> : vector<4x40xf32>
    %7 = tpu.matmul %6, %2, %cst {dimension_numbers = #tpu.dot_dimension_numbers<[1], [0], [0], [1], [0, 0, 1, 1], [], []>} : vector<4x4xbf16>, vector<4x40xbf16>, vector<4x40xf32> -> vector<4x40xf32>
    %c0_7 = arith.constant 0 : index
    %c0_8 = arith.constant 0 : index
    %8 = vector.load %arg5[%c0_7, %c0_8] : memref<4x4xbf16, #tpu.memory_space<vmem>>, vector<4x4xbf16>
    %cst_9 = arith.constant dense<0.000000e+00> : vector<4x40xf32>
    %9 = tpu.matmul %8, %5, %cst_9 {dimension_numbers = #tpu.dot_dimension_numbers<[1], [0], [0], [1], [0, 0, 1, 1], [], []>} : vector<4x4xbf16>, vector<4x40xbf16>, vector<4x40xf32> -> vector<4x40xf32>
    %10 = arith.addf %7, %9 : vector<4x40xf32>
    %c0_10 = arith.constant 0 : index
    %c0_11 = arith.constant 0 : index
    %11 = vector.load %arg6[%c0_10, %c0_11] : memref<4x4xbf16, #tpu.memory_space<vmem>>, vector<4x4xbf16>
    %cst_12 = arith.constant dense<0.000000e+00> : vector<4x40xf32>
    %12 = tpu.matmul %11, %2, %cst_12 {dimension_numbers = #tpu.dot_dimension_numbers<[1], [0], [0], [1], [0, 0, 1, 1], [], []>} : vector<4x4xbf16>, vector<4x40xbf16>, vector<4x40xf32> -> vector<4x40xf32>
    %c0_13 = arith.constant 0 : index
    %c0_14 = arith.constant 0 : index
    %13 = vector.load %arg7[%c0_13, %c0_14] : memref<4x4xbf16, #tpu.memory_space<vmem>>, vector<4x4xbf16>
    %cst_15 = arith.constant dense<0.000000e+00> : vector<4x40xf32>
    %14 = tpu.matmul %13, %5, %cst_15 {dimension_numbers = #tpu.dot_dimension_numbers<[1], [0], [0], [1], [0, 0, 1, 1], [], []>} : vector<4x4xbf16>, vector<4x40xbf16>, vector<4x40xf32> -> vector<4x40xf32>
    %15 = arith.addf %12, %14 : vector<4x40xf32>
    %cst_16 = arith.constant 0.000000e+00 : f32
    %16 = vector.broadcast %cst_16 : f32 to vector<4x40xf32>
    %17 = arith.maximumf %10, %16 : vector<4x40xf32>
    %c0_17 = arith.constant 0 : index
    %c0_18 = arith.constant 0 : index
    %c0_19 = arith.constant 0 : index
    %18 = vector.load %arg8[%c0_17, %c0_18, %c0_19] : memref<1x4x40xf32, #tpu.memory_space<vmem>>, vector<1x4x40xf32>
    %19 = vector.shape_cast %18 : vector<1x4x40xf32> to vector<4x40xf32>
    %20 = vector.shape_cast %17 : vector<4x40xf32> to vector<1x4x40xf32>
    tpu.vector_store %arg8[%c0_17, %c0_18, %c0_19], %20 {strides = array<i32>} : memref<1x4x40xf32, #tpu.memory_space<vmem>>, vector<1x4x40xf32>,
    %cst_20 = arith.constant 0.000000e+00 : f32
    %21 = vector.broadcast %cst_20 : f32 to vector<4x40xf32>
    %22 = arith.maximumf %15, %21 : vector<4x40xf32>
    %c0_21 = arith.constant 0 : index
    %c0_22 = arith.constant 0 : index
    %c0_23 = arith.constant 0 : index
    %23 = vector.load %arg9[%c0_21, %c0_22, %c0_23] : memref<1x4x40xf32, #tpu.memory_space<vmem>>, vector<1x4x40xf32>
    %24 = vector.shape_cast %23 : vector<1x4x40xf32> to vector<4x40xf32>
    %25 = vector.shape_cast %22 : vector<4x40xf32> to vector<1x4x40xf32>
    tpu.vector_store %arg9[%c0_21, %c0_22, %c0_23], %25 {strides = array<i32>} : memref<1x4x40xf32, #tpu.memory_space<vmem>>, vector<1x4x40xf32>,
    return
  }
  func.func @transform_0(%arg0: i32, %arg1: i32) -> (i32, i32, i32) {
    %c0_i32 = arith.constant 0 : i32
    %c0_i32_0 = arith.constant 0 : i32
    return %arg0, %c0_i32, %arg1 : i32, i32, i32
  }
  func.func @transform_1(%arg0: i32, %arg1: i32) -> (i32, i32, i32) {
    %c0_i32 = arith.constant 0 : i32
    %c0_i32_0 = arith.constant 0 : i32
    return %arg0, %c0_i32, %arg1 : i32, i32, i32
  }
  func.func @transform_2(%arg0: i32, %arg1: i32) -> (i32, i32) {
    %c0_i32 = arith.constant 0 : i32
    %c0_i32_0 = arith.constant 0 : i32
    %c0_i32_1 = arith.constant 0 : i32
    return %c0_i32, %c0_i32_0 : i32, i32
  }
  func.func @transform_3(%arg0: i32, %arg1: i32) -> (i32, i32) {
    %c0_i32 = arith.constant 0 : i32
    %c0_i32_0 = arith.constant 0 : i32
    %c0_i32_1 = arith.constant 0 : i32
    return %c0_i32, %c0_i32_0 : i32, i32
  }
  func.func @transform_4(%arg0: i32, %arg1: i32) -> (i32, i32) {
    %c0_i32 = arith.constant 0 : i32
    %c0_i32_0 = arith.constant 0 : i32
    %c0_i32_1 = arith.constant 0 : i32
    return %c0_i32, %c0_i32_0 : i32, i32
  }
  func.func @transform_5(%arg0: i32, %arg1: i32) -> (i32, i32) {
    %c0_i32 = arith.constant 0 : i32
    %c0_i32_0 = arith.constant 0 : i32
    %c0_i32_1 = arith.constant 0 : i32
    return %c0_i32, %c0_i32_0 : i32, i32
  }
  func.func @transform_6(%arg0: i32, %arg1: i32) -> (i32, i32, i32) {
    %c0_i32 = arith.constant 0 : i32
    %c0_i32_0 = arith.constant 0 : i32
    return %arg0, %c0_i32, %arg1 : i32, i32, i32
  }
  func.func @transform_7(%arg0: i32, %arg1: i32) -> (i32, i32, i32) {
    %c0_i32 = arith.constant 0 : i32
    %c0_i32_0 = arith.constant 0 : i32
    return %arg0, %c0_i32, %arg1 : i32, i32, i32
  }
}

module attributes {stable_mosaic.version = 11 : i64} {
  func.func @_spectral_conv_kernel(%arg0: i32, %arg1: i32, %arg2: memref<1x4x128xf32, #tpu.memory_space<vmem>>, %arg3: memref<1x4x128xf32, #tpu.memory_space<vmem>>, %arg4: memref<4x4xbf16, #tpu.memory_space<vmem>>, %arg5: memref<4x4xbf16, #tpu.memory_space<vmem>>, %arg6: memref<4x4xbf16, #tpu.memory_space<vmem>>, %arg7: memref<4x4xbf16, #tpu.memory_space<vmem>>, %arg8: memref<1x4x128xf32, #tpu.memory_space<vmem>>, %arg9: memref<1x4x128xf32, #tpu.memory_space<vmem>>) attributes {dimension_semantics = [#tpu.dimension_semantics<parallel>, #tpu.dimension_semantics<parallel>], iteration_bounds = array<i64: 2, 2>, scalar_prefetch = 0 : i64, scratch_operands = 0 : i64, tpu.core_type = #tpu.core_type<tc>, window_params = [{transform_indices = @transform_0, window_bounds = array<i64: 1, 4, 128>}, {transform_indices = @transform_1, window_bounds = array<i64: 1, 4, 128>}, {pipeline_mode = #tpu.pipeline_mode<synchronous>, transform_indices = @transform_2, window_bounds = array<i64: 4, 4>}, {pipeline_mode = #tpu.pipeline_mode<synchronous>, transform_indices = @transform_3, window_bounds = array<i64: 4, 4>}, {pipeline_mode = #tpu.pipeline_mode<synchronous>, transform_indices = @transform_4, window_bounds = array<i64: 4, 4>}, {pipeline_mode = #tpu.pipeline_mode<synchronous>, transform_indices = @transform_5, window_bounds = array<i64: 4, 4>}, {transform_indices = @transform_6, window_bounds = array<i64: 1, 4, 128>}, {transform_indices = @transform_7, window_bounds = array<i64: 1, 4, 128>}]} {
    %c0 = arith.constant 0 : index
    %c0_0 = arith.constant 0 : index
    %c0_1 = arith.constant 0 : index
    %0 = vector.load %arg2[%c0, %c0_0, %c0_1] : memref<1x4x128xf32, #tpu.memory_space<vmem>>, vector<1x4x128xf32>
    %1 = vector.shape_cast %0 : vector<1x4x128xf32> to vector<4x128xf32>
    %2 = arith.truncf %1 : vector<4x128xf32> to vector<4x128xbf16>
    %c0_2 = arith.constant 0 : index
    %c0_3 = arith.constant 0 : index
    %c0_4 = arith.constant 0 : index
    %3 = vector.load %arg3[%c0_2, %c0_3, %c0_4] : memref<1x4x128xf32, #tpu.memory_space<vmem>>, vector<1x4x128xf32>
    %4 = vector.shape_cast %3 : vector<1x4x128xf32> to vector<4x128xf32>
    %5 = arith.truncf %4 : vector<4x128xf32> to vector<4x128xbf16>
    %c0_5 = arith.constant 0 : index
    %c0_6 = arith.constant 0 : index
    %6 = vector.load %arg4[%c0_5, %c0_6] : memref<4x4xbf16, #tpu.memory_space<vmem>>, vector<4x4xbf16>
    %cst = arith.constant dense<0.000000e+00> : vector<4x128xf32>
    %7 = tpu.matmul %6, %2, %cst {dimension_numbers = #tpu.dot_dimension_numbers<[1], [0], [0], [1], [0, 0, 1, 1], [], []>} : vector<4x4xbf16>, vector<4x128xbf16>, vector<4x128xf32> -> vector<4x128xf32>
    %c0_7 = arith.constant 0 : index
    %c0_8 = arith.constant 0 : index
    %8 = vector.load %arg5[%c0_7, %c0_8] : memref<4x4xbf16, #tpu.memory_space<vmem>>, vector<4x4xbf16>
    %cst_9 = arith.constant dense<0.000000e+00> : vector<4x128xf32>
    %9 = tpu.matmul %8, %5, %cst_9 {dimension_numbers = #tpu.dot_dimension_numbers<[1], [0], [0], [1], [0, 0, 1, 1], [], []>} : vector<4x4xbf16>, vector<4x128xbf16>, vector<4x128xf32> -> vector<4x128xf32>
    %10 = arith.addf %7, %9 : vector<4x128xf32>
    %c0_10 = arith.constant 0 : index
    %c0_11 = arith.constant 0 : index
    %11 = vector.load %arg6[%c0_10, %c0_11] : memref<4x4xbf16, #tpu.memory_space<vmem>>, vector<4x4xbf16>
    %cst_12 = arith.constant dense<0.000000e+00> : vector<4x128xf32>
    %12 = tpu.matmul %11, %2, %cst_12 {dimension_numbers = #tpu.dot_dimension_numbers<[1], [0], [0], [1], [0, 0, 1, 1], [], []>} : vector<4x4xbf16>, vector<4x128xbf16>, vector<4x128xf32> -> vector<4x128xf32>
    %c0_13 = arith.constant 0 : index
    %c0_14 = arith.constant 0 : index
    %13 = vector.load %arg7[%c0_13, %c0_14] : memref<4x4xbf16, #tpu.memory_space<vmem>>, vector<4x4xbf16>
    %cst_15 = arith.constant dense<0.000000e+00> : vector<4x128xf32>
    %14 = tpu.matmul %13, %5, %cst_15 {dimension_numbers = #tpu.dot_dimension_numbers<[1], [0], [0], [1], [0, 0, 1, 1], [], []>} : vector<4x4xbf16>, vector<4x128xbf16>, vector<4x128xf32> -> vector<4x128xf32>
    %15 = arith.addf %12, %14 : vector<4x128xf32>
    %cst_16 = arith.constant 0.000000e+00 : f32
    %16 = vector.broadcast %cst_16 : f32 to vector<4x128xf32>
    %17 = arith.maximumf %10, %16 : vector<4x128xf32>
    %c0_17 = arith.constant 0 : index
    %c0_18 = arith.constant 0 : index
    %c0_19 = arith.constant 0 : index
    %18 = vector.load %arg8[%c0_17, %c0_18, %c0_19] : memref<1x4x128xf32, #tpu.memory_space<vmem>>, vector<1x4x128xf32>
    %19 = vector.shape_cast %18 : vector<1x4x128xf32> to vector<4x128xf32>
    %20 = vector.shape_cast %17 : vector<4x128xf32> to vector<1x4x128xf32>
    tpu.vector_store %arg8[%c0_17, %c0_18, %c0_19], %20 {strides = array<i32>} : memref<1x4x128xf32, #tpu.memory_space<vmem>>, vector<1x4x128xf32>,
    %cst_20 = arith.constant 0.000000e+00 : f32
    %21 = vector.broadcast %cst_20 : f32 to vector<4x128xf32>
    %22 = arith.maximumf %15, %21 : vector<4x128xf32>
    %c0_21 = arith.constant 0 : index
    %c0_22 = arith.constant 0 : index
    %c0_23 = arith.constant 0 : index
    %23 = vector.load %arg9[%c0_21, %c0_22, %c0_23] : memref<1x4x128xf32, #tpu.memory_space<vmem>>, vector<1x4x128xf32>
    %24 = vector.shape_cast %23 : vector<1x4x128xf32> to vector<4x128xf32>
    %25 = vector.shape_cast %22 : vector<4x128xf32> to vector<1x4x128xf32>
    tpu.vector_store %arg9[%c0_21, %c0_22, %c0_23], %25 {strides = array<i32>} : memref<1x4x128xf32, #tpu.memory_space<vmem>>, vector<1x4x128xf32>,
    return
  }
  func.func @transform_0(%arg0: i32, %arg1: i32) -> (i32, i32, i32) {
    %c0_i32 = arith.constant 0 : i32
    %c0_i32_0 = arith.constant 0 : i32
    return %arg0, %c0_i32, %arg1 : i32, i32, i32
  }
  func.func @transform_1(%arg0: i32, %arg1: i32) -> (i32, i32, i32) {
    %c0_i32 = arith.constant 0 : i32
    %c0_i32_0 = arith.constant 0 : i32
    return %arg0, %c0_i32, %arg1 : i32, i32, i32
  }
  func.func @transform_2(%arg0: i32, %arg1: i32) -> (i32, i32) {
    %c0_i32 = arith.constant 0 : i32
    %c0_i32_0 = arith.constant 0 : i32
    %c0_i32_1 = arith.constant 0 : i32
    return %c0_i32, %c0_i32_0 : i32, i32
  }
  func.func @transform_3(%arg0: i32, %arg1: i32) -> (i32, i32) {
    %c0_i32 = arith.constant 0 : i32
    %c0_i32_0 = arith.constant 0 : i32
    %c0_i32_1 = arith.constant 0 : i32
    return %c0_i32, %c0_i32_0 : i32, i32
  }
  func.func @transform_4(%arg0: i32, %arg1: i32) -> (i32, i32) {
    %c0_i32 = arith.constant 0 : i32
    %c0_i32_0 = arith.constant 0 : i32
    %c0_i32_1 = arith.constant 0 : i32
    return %c0_i32, %c0_i32_0 : i32, i32
  }
  func.func @transform_5(%arg0: i32, %arg1: i32) -> (i32, i32) {
    %c0_i32 = arith.constant 0 : i32
    %c0_i32_0 = arith.constant 0 : i32
    %c0_i32_1 = arith.constant 0 : i32
    return %c0_i32, %c0_i32_0 : i32, i32
  }
  func.func @transform_6(%arg0: i32, %arg1: i32) -> (i32, i32, i32) {
    %c0_i32 = arith.constant 0 : i32
    %c0_i32_0 = arith.constant 0 : i32
    return %arg0, %c0_i32, %arg1 : i32, i32, i32
  }
  func.func @transform_7(%arg0: i32, %arg1: i32) -> (i32, i32, i32) {
    %c0_i32 = arith.constant 0 : i32
    %c0_i32_0 = arith.constant 0 : i32
    return %arg0, %c0_i32, %arg1 : i32, i32, i32
  }
}

module attributes {stable_mosaic.version = 11 : i64} {
  func.func @_sum3_conv_kernel(%arg0: i32, %arg1: i32, %arg2: memref<1x4x128xf32, #tpu.memory_space<vmem>>, %arg3: memref<1x4x128xf32, #tpu.memory_space<vmem>>, %arg4: memref<1x4x64xf32, #tpu.memory_space<vmem>>, %arg5: memref<8x4xbf16, #tpu.memory_space<vmem>>, %arg6: memref<1x8x128xf32, #tpu.memory_space<vmem>>) attributes {dimension_semantics = [#tpu.dimension_semantics<parallel>, #tpu.dimension_semantics<parallel>], iteration_bounds = array<i64: 2, 2>, scalar_prefetch = 0 : i64, scratch_operands = 0 : i64, tpu.core_type = #tpu.core_type<tc>, window_params = [{transform_indices = @transform_0, window_bounds = array<i64: 1, 4, 128>}, {transform_indices = @transform_1, window_bounds = array<i64: 1, 4, 128>}, {transform_indices = @transform_2, window_bounds = array<i64: 1, 4, 64>}, {pipeline_mode = #tpu.pipeline_mode<synchronous>, transform_indices = @transform_3, window_bounds = array<i64: 8, 4>}, {transform_indices = @transform_4, window_bounds = array<i64: 1, 8, 128>}]} {
    %c0 = arith.constant 0 : index
    %c0_0 = arith.constant 0 : index
    %c0_1 = arith.constant 0 : index
    %0 = vector.load %arg4[%c0, %c0_0, %c0_1] : memref<1x4x64xf32, #tpu.memory_space<vmem>>, vector<1x4x8xf32>
    %1 = vector.shape_cast %0 : vector<1x4x8xf32> to vector<4x8xf32>
    %c0_2 = arith.constant 0 : index
    %c0_3 = arith.constant 0 : index
    %c8 = arith.constant 8 : index
    %2 = vector.load %arg4[%c0_2, %c0_3, %c8] : memref<1x4x64xf32, #tpu.memory_space<vmem>>, vector<1x4x8xf32>
    %3 = vector.shape_cast %2 : vector<1x4x8xf32> to vector<4x8xf32>
    %c0_4 = arith.constant 0 : index
    %c0_5 = arith.constant 0 : index
    %c16 = arith.constant 16 : index
    %4 = vector.load %arg4[%c0_4, %c0_5, %c16] : memref<1x4x64xf32, #tpu.memory_space<vmem>>, vector<1x4x8xf32>
    %5 = vector.shape_cast %4 : vector<1x4x8xf32> to vector<4x8xf32>
    %c0_6 = arith.constant 0 : index
    %c0_7 = arith.constant 0 : index
    %c24 = arith.constant 24 : index
    %6 = vector.load %arg4[%c0_6, %c0_7, %c24] : memref<1x4x64xf32, #tpu.memory_space<vmem>>, vector<1x4x8xf32>
    %7 = vector.shape_cast %6 : vector<1x4x8xf32> to vector<4x8xf32>
    %c0_8 = arith.constant 0 : index
    %c0_9 = arith.constant 0 : index
    %c32 = arith.constant 32 : index
    %8 = vector.load %arg4[%c0_8, %c0_9, %c32] : memref<1x4x64xf32, #tpu.memory_space<vmem>>, vector<1x4x8xf32>
    %9 = vector.shape_cast %8 : vector<1x4x8xf32> to vector<4x8xf32>
    %c0_10 = arith.constant 0 : index
    %c0_11 = arith.constant 0 : index
    %c40 = arith.constant 40 : index
    %10 = vector.load %arg4[%c0_10, %c0_11, %c40] : memref<1x4x64xf32, #tpu.memory_space<vmem>>, vector<1x4x8xf32>
    %11 = vector.shape_cast %10 : vector<1x4x8xf32> to vector<4x8xf32>
    %c0_12 = arith.constant 0 : index
    %c0_13 = arith.constant 0 : index
    %c48 = arith.constant 48 : index
    %12 = vector.load %arg4[%c0_12, %c0_13, %c48] : memref<1x4x64xf32, #tpu.memory_space<vmem>>, vector<1x4x8xf32>
    %13 = vector.shape_cast %12 : vector<1x4x8xf32> to vector<4x8xf32>
    %c0_14 = arith.constant 0 : index
    %c0_15 = arith.constant 0 : index
    %c56 = arith.constant 56 : index
    %14 = vector.load %arg4[%c0_14, %c0_15, %c56] : memref<1x4x64xf32, #tpu.memory_space<vmem>>, vector<1x4x8xf32>
    %15 = vector.shape_cast %14 : vector<1x4x8xf32> to vector<4x8xf32>
    %16 = tpu.concatenate %1, %1, %3, %3, %5, %5, %7, %7, %9, %9, %11, %11, %13, %13, %15, %15 in 1 : vector<4x8xf32>, vector<4x8xf32>, vector<4x8xf32>, vector<4x8xf32>, vector<4x8xf32>, vector<4x8xf32>, vector<4x8xf32>, vector<4x8xf32>, vector<4x8xf32>, vector<4x8xf32>, vector<4x8xf32>, vector<4x8xf32>, vector<4x8xf32>, vector<4x8xf32>, vector<4x8xf32>, vector<4x8xf32> -> vector<4x128xf32>
    %c0_16 = arith.constant 0 : index
    %c0_17 = arith.constant 0 : index
    %c0_18 = arith.constant 0 : index
    %17 = vector.load %arg2[%c0_16, %c0_17, %c0_18] : memref<1x4x128xf32, #tpu.memory_space<vmem>>, vector<1x4x128xf32>
    %18 = vector.shape_cast %17 : vector<1x4x128xf32> to vector<4x128xf32>
    %c0_19 = arith.constant 0 : index
    %c0_20 = arith.constant 0 : index
    %c0_21 = arith.constant 0 : index
    %19 = vector.load %arg3[%c0_19, %c0_20, %c0_21] : memref<1x4x128xf32, #tpu.memory_space<vmem>>, vector<1x4x128xf32>
    %20 = vector.shape_cast %19 : vector<1x4x128xf32> to vector<4x128xf32>
    %21 = arith.addf %18, %20 : vector<4x128xf32>
    %22 = arith.addf %21, %16 : vector<4x128xf32>
    %c0_22 = arith.constant 0 : index
    %c0_23 = arith.constant 0 : index
    %23 = vector.load %arg5[%c0_22, %c0_23] : memref<8x4xbf16, #tpu.memory_space<vmem>>, vector<8x4xbf16>
    %24 = arith.truncf %22 : vector<4x128xf32> to vector<4x128xbf16>
    %cst = arith.constant dense<0.000000e+00> : vector<8x128xf32>
    %25 = tpu.matmul %23, %24, %cst {dimension_numbers = #tpu.dot_dimension_numbers<[1], [0], [0], [1], [0, 0, 1, 1], [], []>} : vector<8x4xbf16>, vector<4x128xbf16>, vector<8x128xf32> -> vector<8x128xf32>
    %c0_24 = arith.constant 0 : index
    %c0_25 = arith.constant 0 : index
    %c0_26 = arith.constant 0 : index
    %26 = vector.load %arg6[%c0_24, %c0_25, %c0_26] : memref<1x8x128xf32, #tpu.memory_space<vmem>>, vector<1x8x128xf32>
    %27 = vector.shape_cast %26 : vector<1x8x128xf32> to vector<8x128xf32>
    %28 = vector.shape_cast %25 : vector<8x128xf32> to vector<1x8x128xf32>
    tpu.vector_store %arg6[%c0_24, %c0_25, %c0_26], %28 {strides = array<i32>} : memref<1x8x128xf32, #tpu.memory_space<vmem>>, vector<1x8x128xf32>,
    return
  }
  func.func @transform_0(%arg0: i32, %arg1: i32) -> (i32, i32, i32) {
    %c0_i32 = arith.constant 0 : i32
    %c0_i32_0 = arith.constant 0 : i32
    return %arg0, %c0_i32, %arg1 : i32, i32, i32
  }
  func.func @transform_1(%arg0: i32, %arg1: i32) -> (i32, i32, i32) {
    %c0_i32 = arith.constant 0 : i32
    %c0_i32_0 = arith.constant 0 : i32
    return %arg0, %c0_i32, %arg1 : i32, i32, i32
  }
  func.func @transform_2(%arg0: i32, %arg1: i32) -> (i32, i32, i32) {
    %c1_i32 = arith.constant 1 : i32
    %c0_i32 = arith.constant 0 : i32
    %0 = arith.cmpi eq, %c1_i32, %c0_i32 : i32
    %c1_i32_0 = arith.constant 1 : i32
    %1 = arith.select %0, %c1_i32_0, %c1_i32 : i32
    %2 = arith.remsi %arg1, %1 : i32
    %c0_i32_1 = arith.constant 0 : i32
    %3 = arith.cmpi ne, %2, %c0_i32_1 : i32
    %c0_i32_2 = arith.constant 0 : i32
    %4 = arith.cmpi slt, %2, %c0_i32_2 : i32
    %c0_i32_3 = arith.constant 0 : i32
    %5 = arith.cmpi slt, %1, %c0_i32_3 : i32
    %6 = arith.xori %4, %5 : i1
    %7 = arith.andi %6, %3 : i1
    %8 = arith.addi %2, %1 : i32
    %9 = arith.select %7, %8, %2 : i32
    %c0_i32_4 = arith.constant 0 : i32
    %c0_i32_5 = arith.constant 0 : i32
    return %arg0, %c0_i32_4, %9 : i32, i32, i32
  }
  func.func @transform_3(%arg0: i32, %arg1: i32) -> (i32, i32) {
    %c0_i32 = arith.constant 0 : i32
    %c0_i32_0 = arith.constant 0 : i32
    %c0_i32_1 = arith.constant 0 : i32
    return %c0_i32, %c0_i32_0 : i32, i32
  }
  func.func @transform_4(%arg0: i32, %arg1: i32) -> (i32, i32, i32) {
    %c0_i32 = arith.constant 0 : i32
    %c0_i32_0 = arith.constant 0 : i32
    return %arg0, %c0_i32, %arg1 : i32, i32, i32
  }
}

</mosaic_0001>

<bundles_post_ra>
// kernel: spectral_transform.4
= control target key start
LH: loop header
LB: loop body
LE: loop exit
PB: predicated region body
PF: predicated region fallthrough
CT: control target
= control target key end

     0   :  { %s436_s12 = smov 0   ;;  %s438_s13 = smov 0   ;;  %s493_s0 = inlined_call_operand.vmem [shape: f32[2,4,256], index: 0, kind: input, shape index: {}]   ;;  %s494_s1 = inlined_call_operand.vmem [shape: bf16[4,4], index: 1, kind: input, shape index: {}]   ;;  %s495_s2 = inlined_call_operand.vmem [shape: f32[4,1], index: 2, kind: input, shape index: {}]   ;;  %s496_s3 = inlined_call_operand.vmem [shape: f32[2,4,256], index: 3, kind: output, shape index: {}]  }
   0x1   :  { %s440_s14 = smov 0   ;;  %s442_s15 = smov 0  }
   0x2   :  { %s444_s16 = smov 0  }
   0x3 LB: > { %s22_s17 = sadd.s32 1, %s405_s14  ;;  %s25_s18 = sadd.s32 1, %s409_s15  ;;  %s413_s16 = sphi %s444_s16, %s13_s16   ;;  %s409_s15 = sphi %s442_s15, %s500_s15   ;;  %s405_s14 = sphi %s440_s14, %s499_s14   ;;  %s401_s13 = sphi %s438_s13, %s498_s13   ;;  %s397_s12 = sphi %s436_s12, %s497_s12  }
   0x4   : > { %p23_p0 = scmp.ge.s32.totalorder %s22_s17, 2  ;;  %p325_p1 = scmp.ge.s32.totalorder %s413_s16, 1 }
   0x5   : > { %p156_p2 = scmp.lt.s32.totalorder %s413_s16, 5 }
   0x6   : > { %s502_s17 = smov (%p23_p0, %s22_s17), 0  ;;  %s504_s18 = smov (!%p23_p0, %s25_s18), %s409_s15 }
   0x7   : > { %p157_p3 = pnand %p325_p1, %p156_p2  ;;  %p27_p4 = scmp.ge.s32.totalorder %s504_s18, 2 }
   0x8   : > { %p186_p5 = scmp.lt.s32.totalorder (!%p157_p3), %s401_s13, 1  ;;  %p188_p6 = scmp.lt.s32.totalorder (!%p157_p3), %s397_s12, 1 }
   0x9   : > { %s506_s18 = smov (%p27_p4, %s504_s18), 0  ;;  %160 = sbr.rel (%p157_p3) target bundleno = 160 (0xa0), region = 32 }
   0xe   : > { %v206_v0 = vld [vmem:[%s495_s2] sm:$0xf]  ;;  %s508_s13 = smov (!%p186_p5, %s401_s13), 1  ;;  %v415_v1 = vmov 0   ;;  %s510_s12 = smov (!%p188_p6, %s397_s12), 1  ;;  %vm216_vm0 = vcmask 1041408  }
   0xf   : > { %374 = vset.pattern.permute.xlu0 %v415_v1  ;;  %s326_s21 = sshll.u32 %s508_s13, 1  ;;  %v205_v5 = vld [vmem:[%s494_s1] sm:$0x3]  ;;  %vm212_vm1 = vcmask 31744  }
  0x10   : > { %209 = vperm.xlu0 %374, %v206_v0   ;;  %s191_s22 = sadd.s32 %s326_s21, %s510_s12 }
  0x11   : > { %s327_s23 = sshll.u32 %s191_s22, 2 }
  0x12   : > { %s193_s26 = scalar_lea.vmem %s493_s0, %s327_s23  ;;  %s201_s4 = scalar_lea.vmem %s496_s3, %s327_s23 }
  0x13   : > { %v203_v2 = vld [vmem:[%s193_s26] sm:$0xf] }
  0x14   : > { %v204_v3 = vpack.c.bf16 %v203_v2, %v203_v2 }
  0x16   : > { %v218_v4 = vsel %vm216_vm0, %v204_v3, 0 }
  0x17   : > { %227 = vmatpush.bf16.msra.mxu0 %v218_v4 }
  0x1a   : > { %330 = vmatmul.msk.bf16.vlgmr.msra.gmra.mxu0 %vm212_vm1, %v205_v5 }
  0x82   : > { %v210_v6 = vpop.permute.xlu0 %209 }
  0x97   : > { %v229_v7 = vpop.f32.mrf.mxu0 }
  0x98   : > { %v230_v8 = vadd.f32 %v229_v7, %v210_v6 }
  0x9a   : > { %v233_v9 = vmax.f32 %v230_v8, 0.0 }
  0x9c   : > { %234 = vst [vmem:[%s201_s4] sm:$0xf] %v233_v9 }
  0x9f   : > { %v231_v10 = vpop.f32.mrf.mxu0 }
  0xa0 PF: > { %s13_s16 = sadd.s32 1, %s413_s16   ;;  %s497_s12 = smov %s405_s14 }
  0xa1   : > { %p10_p7 = scmp.ge.s32.totalorder %s13_s16, 6   ;;  %s498_s13 = smov %s409_s15 }
  0xa2   : > { %s499_s14 = smov %s502_s17  ;;  %s500_s15 = smov %s506_s18 }
  0xa3   :  { %12 = sbr.rel (!%p10_p7) target bundleno = 3 (0x3), region = 62 }

// kernel: spectral_transform.6
= control target key start
LH: loop header
LB: loop body
LE: loop exit
PB: predicated region body
PF: predicated region fallthrough
CT: control target
= control target key end

     0   :  { %s671_s24 = smov 0   ;;  %s673_s25 = smov 0   ;;  %s728_s0 = inlined_call_operand.vmem [shape: f32[2,4,40], index: 0, kind: input, shape index: {}]   ;;  %s729_s1 = inlined_call_operand.vmem [shape: f32[2,4,40], index: 1, kind: input, shape index: {}]   ;;  %s730_s2 = inlined_call_operand.vmem [shape: bf16[4,4], index: 2, kind: input, shape index: {}]   ;;  %s731_s3 = inlined_call_operand.vmem [shape: bf16[4,4], index: 3, kind: input, shape index: {}]   ;;  %s732_s4 = inlined_call_operand.vmem [shape: bf16[4,4], index: 4, kind: input, shape index: {}]   ;;  %s733_s5 = inlined_call_operand.vmem [shape: bf16[4,4], index: 5, kind: input, shape index: {}]   ;;  %s734_s6 = inlined_call_operand.vmem [shape: f32[2,4,40], index: 6, kind: output, shape index: {0}]   ;;  %s735_s7 = inlined_call_operand.vmem [shape: f32[2,4,40], index: 7, kind: output, shape index: {1}]  }
   0x1   :  { %s675_s26 = smov 0  }
   0x2 LB: > { %s30_s27 = sadd.s32 1, %s625_s25  ;;  %p572_p0 = scmp.ge.s32.totalorder %s629_s26, 1  ;;  %s629_s26 = sphi %s675_s26, %s18_s26   ;;  %s625_s25 = sphi %s673_s25, %s737_s25   ;;  %s621_s24 = sphi %s671_s24, %s736_s24  }
   0x3   : > { %p32_p1 = scmp.ge.s32.totalorder %s30_s27, 2  ;;  %p274_p2 = scmp.lt.s32.totalorder %s629_s26, 3 }
   0x5   : > { %s739_s27 = smov (%p32_p1, %s30_s27), 0  ;;  %p275_p3 = pnand %p572_p0, %p274_p2 }
   0x6   : > { %p324_p4 = scmp.lt.s32.totalorder (!%p275_p3), %s621_s24, 1 }
   0x7   : > { %278 = sbr.rel (%p275_p3) target bundleno = 163 (0xa3), region = 44 }
   0xc   : > { %s741_s24 = smov (!%p324_p4, %s621_s24), 1  ;;  %vm363_vm0 = vcmask 1041408   ;;  %v358_v6 = vld [vmem:[%s731_s3] sm:$0x3]  ;;  %vm359_vm1 = vcmask 31744   ;;  %vm434_vm2 = vcmask 322560  }
   0xd   : > { %s689_s28 = sshll.u32 %s741_s24, 2  ;;  %v357_v7 = vld [vmem:[%s730_s2] sm:$0x3] }
   0xe   : > { %s337_s8 = scalar_lea.vmem %s729_s1, %s689_s28  ;;  %s330_s11 = scalar_lea.vmem %s728_s0, %s689_s28  ;;  %v400_v8 = vld [vmem:[%s733_s5] sm:$0x3] }
   0xf   : > { %v355_v0 = vld [vmem:[%s337_s8] sm:$0xf]  ;;  %s344_s22 = scalar_lea.vmem %s734_s6, %s689_s28  ;;  %s351_s29 = scalar_lea.vmem %s735_s7, %s689_s28 }
  0x10   : > { %v353_v1 = vld [vmem:[%s330_s11] sm:$0xf]  ;;  %v356_v2 = vpack.c.bf16 %v355_v0, %v355_v0 }
  0x11   : > { %v354_v3 = vpack.c.bf16 %v353_v1, %v353_v1  ;;  %v399_v9 = vld [vmem:[%s732_s4] sm:$0x3] }
  0x12   : > { %v365_v4 = vsel %vm363_vm0, %v356_v2, 0 }
  0x13   : > { %v384_v5 = vsel %vm363_vm0, %v354_v3, 0  ;;  %374 = vmatpush.bf16.msra.mxu0 %v365_v4  ;;  %411 = vmatpush.bf16.msra.mxu2 %v365_v4 }
  0x14   : > { %393 = vmatpush.bf16.msra.mxu1 %v384_v5  ;;  %427 = vmatpush.bf16.msra.mxu3 %v384_v5 }
  0x16   : > { %577 = vmatmul.msk.bf16.vlgmr.msra.gmra.mxu0 %vm359_vm1, %v358_v6  ;;  %579 = vmatmul.msk.bf16.vlgmr.msra.gmra.mxu2 %vm359_vm1, %v400_v8 }
  0x17   : > { %578 = vmatmul.msk.bf16.vlgmr.msra.gmra.mxu1 %vm359_vm1, %v357_v7  ;;  %580 = vmatmul.msk.bf16.vlgmr.msra.gmra.mxu3 %vm359_vm1, %v399_v9 }
  0x93   : > { %v376_v10 = vpop.f32.mrf.mxu0 }
  0x94   : > { %v395_v11 = vpop.f32.mrf.mxu1 }
  0x95   : > { %v396_v12 = vadd.f32 %v395_v11, %v376_v10 }
  0x97   : > { %v433_v13 = vmax.f32 %v396_v12, 0.0 }
  0x99   : > { %435 = vst.msk [vmem:[%s344_s22] sm:$0xf] %vm434_vm2, %v433_v13  ;;  %v413_v14 = vpop.f32.mrf.mxu2 }
  0x9a   : > { %v429_v15 = vpop.f32.mrf.mxu3 }
  0x9b   : > { %v430_v16 = vadd.f32 %v429_v15, %v413_v14  ;;  %v378_v17 = vpop.f32.mrf.mxu0 }
  0x9c   : > { %v397_v18 = vpop.f32.mrf.mxu1 }
  0x9d   : > { %v436_v19 = vmax.f32 %v430_v16, 0.0 }
  0x9f   : > { %437 = vst.msk [vmem:[%s351_s29] sm:$0xf] %vm434_vm2, %v436_v19 }
  0xa1   : > { %v415_v20 = vpop.f32.mrf.mxu2 }
  0xa2   : > { %v431_v21 = vpop.f32.mrf.mxu3 }
  0xa3 PF: > { %s18_s26 = sadd.s32 1, %s629_s26   ;;  %s736_s24 = smov %s625_s25 }
  0xa4   : > { %p15_p5 = scmp.ge.s32.totalorder %s18_s26, 4   ;;  %s737_s25 = smov %s739_s27 }
  0xa6   :  { %17 = sbr.rel (!%p15_p5) target bundleno = 2 (0x2), region = 89 }

// kernel: reverse.1
= control target key start
LH: loop header
LB: loop body
LE: loop exit
PB: predicated region body
PF: predicated region fallthrough
CT: control target
= control target key end

     0   :  { %v79_v8 = vld [vmem:[#allocation1 + $0x38] sm:$0xf]  ;;  %v87_v9 = vld [vmem:[#allocation1 + $0x30] sm:$0xf]  ;;  %v95_v10 = vld [vmem:[#allocation1 + $0x28] sm:$0xf]  ;;  %v144_v16 = vlaneseq  ;;  %s447_s0 = inlined_call_operand.vmem [shape: f32[2,4,8,3], index: 0, kind: input, shape index: {}]   ;;  %s448_s1 = inlined_call_operand.vmem [shape: f32[2,4,8,3], index: 1, kind: output, shape index: {}]  }
   0x1   :  { %v19_v0 = vld [vmem:[%s447_s0] sm:$0xf]  ;;  %v21_v1 = vld [vmem:[%s447_s0 + $0x4] sm:$0xf]  ;;  %v23_v2 = vld [vmem:[%s447_s0 + $0x8] sm:$0xf] }
   0x2   :  { %20 = vst [vmem:[#allocation1 + $0x4] sm:$0xf] %v19_v0  ;;  %v25_v3 = vld [vmem:[%s447_s0 + $0xc] sm:$0xf]  ;;  %v27_v4 = vld [vmem:[%s447_s0 + $0x10] sm:$0xf] }
   0x3   :  { %22 = vst [vmem:[#allocation1 + $0xc] sm:$0xf] %v21_v1  ;;  %v29_v5 = vld [vmem:[%s447_s0 + $0x14] sm:$0xf]  ;;  %v31_v6 = vld [vmem:[%s447_s0 + $0x18] sm:$0xf] }
   0x4   :  { %24 = vst [vmem:[#allocation1 + $0x14] sm:$0xf] %v23_v2  ;;  %v33_v7 = vld [vmem:[%s447_s0 + $0x1c] sm:$0xf]  ;;  %v103_v11 = vld [vmem:[#allocation1 + $0x20] sm:$0xf] }
   0x5   :  { %26 = vst [vmem:[#allocation1 + $0x1c] sm:$0xf] %v25_v3  ;;  %v111_v18 = vld [vmem:[#allocation1 + $0x18] sm:$0xf]  ;;  %v119_v20 = vld [vmem:[#allocation1 + $0x10] sm:$0xf] }
   0x6   :  { %28 = vst [vmem:[#allocation1 + $0x24] sm:$0xf] %v27_v4  ;;  %v127_v21 = vld [vmem:[#allocation1 + $0x8] sm:$0xf]  ;;  %v145_v23 = vshrl.u32 %v144_v16, 7 }
   0x7   :  { %30 = vst [vmem:[#allocation1 + $0x2c] sm:$0xf] %v29_v5  ;;  %v134_v28 = vld [vmem:[#allocation1] sm:$0xf] }
   0x8   :  { %32 = vst [vmem:[#allocation1 + $0x34] sm:$0xf] %v31_v6  ;;  %vm146_vm0 = vcmp.lt.s32.totalorder %v145_v23, 3 }
   0x9   :  { %34 = vst [vmem:[#allocation1 + $0x3c] sm:$0xf] %v33_v7  ;;  %v131_v24 = vld [vmem:[#allocation1 + $0x4] sm:$0xf] }
   0xa   :  { %81 = vst [vmem:[#allocation0 + $0x70] sm:$0xf] %v79_v8  ;;  %v123_v22 = vld [vmem:[#allocation1 + $0xc] sm:$0xf] }
   0xb   :  { %89 = vst [vmem:[#allocation0 + $0x60] sm:$0xf] %v87_v9  ;;  %v115_v19 = vld [vmem:[#allocation1 + $0x14] sm:$0xf] }
   0xc   :  { %97 = vst [vmem:[#allocation0 + $0x50] sm:$0xf] %v95_v10  ;;  %v107_v15 = vld [vmem:[#allocation1 + $0x1c] sm:$0xf] }
   0xd   :  { %v99_v12 = vld [vmem:[#allocation1 + $0x24] sm:$0xf]  ;;  %105 = vst [vmem:[#allocation0 + $0x40] sm:$0xf] %v103_v11 }
   0xe   :  { %v91_v13 = vld [vmem:[#allocation1 + $0x2c] sm:$0xf]  ;;  %101 = vst [vmem:[#allocation0 + $0x48] sm:$0xf] %v99_v12 }
   0xf   :  { %v83_v14 = vld [vmem:[#allocation1 + $0x34] sm:$0xf]  ;;  %93 = vst [vmem:[#allocation0 + $0x58] sm:$0xf] %v91_v13 }
  0x10   :  { %v75_v17 = vld [vmem:[#allocation1 + $0x3c] sm:$0xf]  ;;  %85 = vst [vmem:[#allocation0 + $0x68] sm:$0xf] %v83_v14 }
  0x11   :  { %77 = vst [vmem:[#allocation0 + $0x78] sm:$0xf] %v75_v17  ;;  %v235_v52 = vld [vmem:[#allocation0 + $0x77] ss:$-1 sm:$0xff] }
  0x12   :  { %109 = vst [vmem:[#allocation0 + $0x38] sm:$0xf] %v107_v15  ;;  %v221_v46 = vld [vmem:[#allocation0 + $0x67] ss:$-1 sm:$0xff]  ;;  %v236_v56 = vrot.slane %v235_v52, 5 }
  0x13   :  { %113 = vst [vmem:[#allocation0 + $0x30] sm:$0xf] %v111_v18  ;;  %v207_v27 = vld [vmem:[#allocation0 + $0x57] ss:$-1 sm:$0xff]  ;;  %v222_v53 = vrot.slane %v221_v46, 5 }
  0x14   :  { %117 = vst [vmem:[#allocation0 + $0x28] sm:$0xf] %v115_v19  ;;  %v193_v25 = vld [vmem:[#allocation0 + $0x47] ss:$-1 sm:$0xff]  ;;  %v208_v31 = vrot.slane %v207_v27, 5 }
  0x15   :  { %121 = vst [vmem:[#allocation0 + $0x20] sm:$0xf] %v119_v20  ;;  %v198_v26 = vld [vmem:[#allocation0 + $0x4f] ss:$-1 sm:$0xff]  ;;  %v194_v29 = vrot.slane %v193_v25, 5 }
  0x16   :  { %125 = vst [vmem:[#allocation0 + $0x18] sm:$0xf] %v123_v22  ;;  %v199_v30 = vrot.slane %v198_v26, 5  ;;  %v212_v43 = vld [vmem:[#allocation0 + $0x5f] ss:$-1 sm:$0xff] }
  0x17   :  { %129 = vst [vmem:[#allocation0 + $0x10] sm:$0xf] %v127_v21  ;;  %v226_v49 = vld [vmem:[#allocation0 + $0x6f] ss:$-1 sm:$0xff]  ;;  %v213_v51 = vrot.slane %v212_v43, 5 }
  0x18   :  { %133 = vst [vmem:[#allocation0 + $0x8] sm:$0xf] %v131_v24  ;;  %v240_v54 = vld [vmem:[#allocation0 + $0x7f] ss:$-1 sm:$0xff]  ;;  %v227_v55 = vrot.slane %v226_v49, 5 }
  0x19   :  { %135 = vst [vmem:[#allocation0] sm:$0xf] %v134_v28  ;;  %v184_v32 = vld [vmem:[#allocation0 + $0x3f] ss:$-1 sm:$0xff]  ;;  %v241_v57 = vrot.slane %v240_v54, 5 }
  0x1a   :  { %v179_v33 = vld [vmem:[#allocation0 + $0x37] ss:$-1 sm:$0xff]  ;;  %v185_v34 = vrot.slane %v184_v32, 5  ;;  %195 = vst [vmem:[#allocation2 + $0x20] sm:$0xff] %v194_v29 }
  0x1b   :  { %v170_v35 = vld [vmem:[#allocation0 + $0x2f] ss:$-1 sm:$0xff]  ;;  %v180_v36 = vrot.slane %v179_v33, 5  ;;  %203 = vst.msk [vmem:[#allocation2 + $0x20] sm:$0xff] %vm146_vm0, %v199_v30 }
  0x1c   :  { %v165_v37 = vld [vmem:[#allocation0 + $0x27] ss:$-1 sm:$0xff]  ;;  %v171_v38 = vrot.slane %v170_v35, 5  ;;  %209 = vst [vmem:[#allocation2 + $0x28] sm:$0xff] %v208_v31 }
  0x1d   :  { %v156_v39 = vld [vmem:[#allocation0 + $0x1f] ss:$-1 sm:$0xff]  ;;  %v166_v40 = vrot.slane %v165_v37, 5  ;;  %181 = vst [vmem:[#allocation2 + $0x18] sm:$0xff] %v180_v36 }
  0x1e   :  { %v151_v41 = vld [vmem:[#allocation0 + $0x17] ss:$-1 sm:$0xff]  ;;  %v157_v42 = vrot.slane %v156_v39, 5  ;;  %189 = vst.msk [vmem:[#allocation2 + $0x18] sm:$0xff] %vm146_vm0, %v185_v34 }
  0x1f   :  { %v142_v44 = vld [vmem:[#allocation0 + $0xf] ss:$-1 sm:$0xff]  ;;  %v152_v45 = vrot.slane %v151_v41, 5  ;;  %167 = vst [vmem:[#allocation2 + $0x10] sm:$0xff] %v166_v40 }
  0x20   :  { %v137_v47 = vld [vmem:[#allocation0 + $0x7] ss:$-1 sm:$0xff]  ;;  %v143_v48 = vrot.slane %v142_v44, 5  ;;  %175 = vst.msk [vmem:[#allocation2 + $0x10] sm:$0xff] %vm146_vm0, %v171_v38 }
  0x21   :  { %v138_v50 = vrot.slane %v137_v47, 5  ;;  %153 = vst [vmem:[#allocation2 + $0x8] sm:$0xff] %v152_v45 }
  0x22   :  { %161 = vst.msk [vmem:[#allocation2 + $0x8] sm:$0xff] %vm146_vm0, %v157_v42  ;;  %v271_v62 = vld [vmem:[#allocation2 + $0x20] sm:$0xf] }
  0x23   :  { %139 = vst [vmem:[#allocation2] sm:$0xff] %v138_v50 }
  0x24   :  { %147 = vst.msk [vmem:[#allocation2] sm:$0xff] %vm146_vm0, %v143_v48 }
  0x25   :  { %217 = vst.msk [vmem:[#allocation2 + $0x28] sm:$0xff] %vm146_vm0, %v213_v51  ;;  %v265_v60 = vld [vmem:[#allocation2 + $0x18] sm:$0xf] }
  0x26   :  { %223 = vst [vmem:[#allocation2 + $0x30] sm:$0xff] %v222_v53 }
  0x27   :  { %231 = vst.msk [vmem:[#allocation2 + $0x30] sm:$0xff] %vm146_vm0, %v227_v55  ;;  %v259_v58 = vld [vmem:[#allocation2 + $0x10] sm:$0xf] }
  0x28   :  { %237 = vst [vmem:[#allocation2 + $0x38] sm:$0xff] %v236_v56 }
  0x29   :  { %245 = vst.msk [vmem:[#allocation2 + $0x38] sm:$0xff] %vm146_vm0, %v241_v57  ;;  %v253_v59 = vld [vmem:[#allocation2 + $0x8] sm:$0xf] }
  0x2a   :  { %257 = vst [vmem:[#allocation3 + $0x4] sm:$0xf] %v253_v59 }
  0x2b   :  { %v248_v61 = vld [vmem:[#allocation2] sm:$0xf]  ;;  %263 = vst [vmem:[#allocation3 + $0x8] sm:$0xf] %v259_v58 }
  0x2c   :  { %251 = vst [vmem:[#allocation3] sm:$0xf] %v248_v61  ;;  %v277_v63 = vld [vmem:[#allocation2 + $0x28] sm:$0xf] }
  0x2d   :  { %269 = vst [vmem:[#allocation3 + $0xc] sm:$0xf] %v265_v60 }
  0x2e   :  { %275 = vst [vmem:[#allocation3 + $0x10] sm:$0xf] %v271_v62  ;;  %v283_v0 = vld [vmem:[#allocation2 + $0x30] sm:$0xf] }
  0x2f   :  { %281 = vst [vmem:[#allocation3 + $0x14] sm:$0xf] %v277_v63 }
  0x30   :  { %287 = vst [vmem:[#allocation3 + $0x18] sm:$0xf] %v283_v0  ;;  %v289_v1 = vld [vmem:[#allocation2 + $0x38] sm:$0xf] }
  0x31   :  { %293 = vst [vmem:[#allocation3 + $0x1c] sm:$0xf] %v289_v1 }
  0x33   :  { %v310_v2 = vld [vmem:[#allocation3] sm:$0xff]  }
  0x34   :  { %311 = vst [vmem:[%s448_s1] sm:$0xff] %v310_v2   ;;  %v314_v3 = vld [vmem:[#allocation3 + $0x8] sm:$0xff]  }
  0x35   :  { %315 = vst [vmem:[%s448_s1 + $0x8] sm:$0xff] %v314_v3  }
  0x36   :  { %v318_v4 = vld [vmem:[#allocation3 + $0x10] sm:$0xff]  }
  0x37   :  { %319 = vst [vmem:[%s448_s1 + $0x10] sm:$0xff] %v318_v4  }
  0x38   :  { %v322_v5 = vld [vmem:[#allocation3 + $0x18] sm:$0xff]  }
  0x39   :  { %323 = vst [vmem:[%s448_s1 + $0x18] sm:$0xff] %v322_v5  }

// kernel: spectral_transform.5
= control target key start
LH: loop header
LB: loop body
LE: loop exit
PB: predicated region body
PF: predicated region fallthrough
CT: control target
= control target key end

     0   :  { %s737_s24 = smov 0   ;;  %s739_s25 = smov 0   ;;  %s812_s0 = inlined_call_operand.vmem [shape: f32[2,4,144], index: 0, kind: input, shape index: {}]   ;;  %s813_s1 = inlined_call_operand.vmem [shape: f32[2,4,144], index: 1, kind: input, shape index: {}]   ;;  %s814_s2 = inlined_call_operand.vmem [shape: bf16[4,4], index: 2, kind: input, shape index: {}]   ;;  %s815_s3 = inlined_call_operand.vmem [shape: bf16[4,4], index: 3, kind: input, shape index: {}]   ;;  %s816_s4 = inlined_call_operand.vmem [shape: bf16[4,4], index: 4, kind: input, shape index: {}]   ;;  %s817_s5 = inlined_call_operand.vmem [shape: bf16[4,4], index: 5, kind: input, shape index: {}]   ;;  %s818_s6 = inlined_call_operand.vmem [shape: f32[2,4,144], index: 6, kind: output, shape index: {0}]   ;;  %s819_s7 = inlined_call_operand.vmem [shape: f32[2,4,144], index: 7, kind: output, shape index: {1}]  }
   0x1   :  { %s741_s26 = smov 0   ;;  %s743_s27 = smov 0  }
   0x2   :  { %s745_s28 = smov 0  }
   0x3 LB: > { %s27_s29 = sadd.s32 1, %s687_s26  ;;  %s30_s30 = sadd.s32 1, %s691_s27  ;;  %s695_s28 = sphi %s745_s28, %s18_s28   ;;  %s691_s27 = sphi %s743_s27, %s823_s27   ;;  %s687_s26 = sphi %s741_s26, %s822_s26   ;;  %s683_s25 = sphi %s739_s25, %s821_s25   ;;  %s679_s24 = sphi %s737_s24, %s820_s24  }
   0x4   : > { %p28_p0 = scmp.ge.s32.totalorder %s27_s29, 2  ;;  %p602_p1 = scmp.ge.s32.totalorder %s695_s28, 1 }
   0x5   : > { %p276_p2 = scmp.lt.s32.totalorder %s695_s28, 5 }
   0x6   : > { %s825_s29 = smov (%p28_p0, %s27_s29), 0  ;;  %s827_s30 = smov (!%p28_p0, %s30_s30), %s691_s27 }
   0x7   : > { %p277_p3 = pnand %p602_p1, %p276_p2  ;;  %p32_p4 = scmp.ge.s32.totalorder %s827_s30, 2 }
   0x8   : > { %p330_p5 = scmp.lt.s32.totalorder (!%p277_p3), %s683_s25, 1  ;;  %p332_p6 = scmp.lt.s32.totalorder (!%p277_p3), %s679_s24, 1 }
   0x9   : > { %s829_s30 = smov (%p32_p4, %s827_s30), 0  ;;  %280 = sbr.rel (%p277_p3) target bundleno = 167 (0xa7), region = 44 }
   0xe   : > { %s831_s25 = smov (!%p330_p5, %s683_s25), 1  ;;  %s833_s24 = smov (!%p332_p6, %s679_s24), 1  ;;  %vm373_vm0 = vcmask 1041408   ;;  %v368_v6 = vld [vmem:[%s815_s3] sm:$0x3]  ;;  %vm369_vm1 = vcmask 31744  }
   0xf   : > { %s603_s8 = sshll.u32 %s831_s25, 1  ;;  %v367_v7 = vld [vmem:[%s814_s2] sm:$0x3] }
  0x10   : > { %s335_s9 = sadd.s32 %s603_s8, %s833_s24  ;;  %v410_v8 = vld [vmem:[%s817_s5] sm:$0x3] }
  0x11   : > { %s767_s10 = sshll.u32 %s335_s9, 2  ;;  %v409_v9 = vld [vmem:[%s816_s4] sm:$0x3] }
  0x12   : > { %s345_s13 = scalar_lea.vmem %s813_s1, %s767_s10  ;;  %s337_s16 = scalar_lea.vmem %s812_s0, %s767_s10 }
  0x13   : > { %v365_v0 = vld [vmem:[%s345_s13] sm:$0xf]  ;;  %s353_s9 = scalar_lea.vmem %s818_s6, %s767_s10  ;;  %s361_s13 = scalar_lea.vmem %s819_s7, %s767_s10 }
  0x14   : > { %v363_v1 = vld [vmem:[%s337_s16] sm:$0xf]  ;;  %v366_v2 = vpack.c.bf16 %v365_v0, %v365_v0 }
  0x15   : > { %v364_v3 = vpack.c.bf16 %v363_v1, %v363_v1 }
  0x16   : > { %v375_v4 = vsel %vm373_vm0, %v366_v2, 0 }
  0x17   : > { %v394_v5 = vsel %vm373_vm0, %v364_v3, 0  ;;  %384 = vmatpush.bf16.msra.mxu0 %v375_v4  ;;  %421 = vmatpush.bf16.msra.mxu2 %v375_v4 }
  0x18   : > { %403 = vmatpush.bf16.msra.mxu1 %v394_v5  ;;  %437 = vmatpush.bf16.msra.mxu3 %v394_v5 }
  0x1a   : > { %611 = vmatmul.msk.bf16.vlgmr.msra.gmra.mxu0 %vm369_vm1, %v368_v6  ;;  %613 = vmatmul.msk.bf16.vlgmr.msra.gmra.mxu2 %vm369_vm1, %v410_v8 }
  0x1b   : > { %612 = vmatmul.msk.bf16.vlgmr.msra.gmra.mxu1 %vm369_vm1, %v367_v7  ;;  %614 = vmatmul.msk.bf16.vlgmr.msra.gmra.mxu3 %vm369_vm1, %v409_v9 }
  0x97   : > { %v386_v10 = vpop.f32.mrf.mxu0 }
  0x98   : > { %v405_v11 = vpop.f32.mrf.mxu1 }
  0x99   : > { %v406_v12 = vadd.f32 %v405_v11, %v386_v10 }
  0x9b   : > { %v443_v13 = vmax.f32 %v406_v12, 0.0 }
  0x9d   : > { %444 = vst [vmem:[%s353_s9] sm:$0xf] %v443_v13  ;;  %v423_v14 = vpop.f32.mrf.mxu2 }
  0x9e   : > { %v439_v15 = vpop.f32.mrf.mxu3 }
  0x9f   : > { %v440_v16 = vadd.f32 %v439_v15, %v423_v14  ;;  %v388_v17 = vpop.f32.mrf.mxu0 }
  0xa0   : > { %v407_v18 = vpop.f32.mrf.mxu1 }
  0xa1   : > { %v445_v19 = vmax.f32 %v440_v16, 0.0 }
  0xa3   : > { %446 = vst [vmem:[%s361_s13] sm:$0xf] %v445_v19 }
  0xa5   : > { %v425_v20 = vpop.f32.mrf.mxu2 }
  0xa6   : > { %v441_v21 = vpop.f32.mrf.mxu3 }
  0xa7 PF: > { %s18_s28 = sadd.s32 1, %s695_s28   ;;  %s820_s24 = smov %s687_s26 }
  0xa8   : > { %p15_p7 = scmp.ge.s32.totalorder %s18_s28, 6   ;;  %s821_s25 = smov %s691_s27 }
  0xa9   : > { %s822_s26 = smov %s825_s29  ;;  %s823_s27 = smov %s829_s30 }
  0xaa   :  { %17 = sbr.rel (!%p15_p7) target bundleno = 3 (0x3), region = 89 }

// kernel: reverse.0
= control target key start
LH: loop header
LB: loop body
LE: loop exit
PB: predicated region body
PF: predicated region fallthrough
CT: control target
= control target key end

     0   :  { %v72_v3 = vlaneseq  ;;  %v65_v6 = vld [vmem:[#allocation0 + $0x7] ss:$-1 sm:$0xff]  ;;  %v79_v8 = vld [vmem:[#allocation0 + $0x17] ss:$-1 sm:$0xff]  ;;  %s331_s0 = inlined_call_operand.vmem [shape: f32[2,4,16,7], index: 0, kind: input, shape index: {}]   ;;  %s332_s1 = inlined_call_operand.vmem [shape: f32[2,4,16,7], index: 1, kind: output, shape index: {}]  }
   0x1   :  { %v45_v0 = vld [vmem:[%s331_s0] sm:$0xff]  ;;  %v47_v1 = vld [vmem:[%s331_s0 + $0x8] sm:$0xff]  ;;  %v49_v2 = vld [vmem:[%s331_s0 + $0x10] sm:$0xff]  ;;  %v66_v12 = vrot.slane %v65_v6, 1  ;;  %v80_v13 = vrot.slane %v79_v8, 1 }
   0x2   :  { %46 = vst [vmem:[#allocation0 + $0x8] sm:$0xff] %v45_v0  ;;  %v51_v4 = vld [vmem:[%s331_s0 + $0x18] sm:$0xff]  ;;  %v53_v5 = vld [vmem:[%s331_s0 + $0x20] sm:$0xff]  ;;  %v55_v7 = vld [vmem:[%s331_s0 + $0x28] sm:$0xff]  ;;  %v73_v10 = vshrl.u32 %v72_v3, 7 }
   0x3   :  { %48 = vst [vmem:[#allocation0 + $0x18] sm:$0xff] %v47_v1  ;;  %v57_v9 = vld [vmem:[%s331_s0 + $0x30] sm:$0xff]  ;;  %v59_v11 = vld [vmem:[%s331_s0 + $0x38] sm:$0xff]  ;;  %v93_v14 = vld [vmem:[#allocation0 + $0x27] ss:$-1 sm:$0xff] }
   0x4   :  { %50 = vst [vmem:[#allocation0 + $0x28] sm:$0xff] %v49_v2  ;;  %vm74_vm0 = vcmp.lt.s32.totalorder %v73_v10, 7  ;;  %v107_v16 = vld [vmem:[#allocation0 + $0x37] ss:$-1 sm:$0xff]  ;;  %v94_v19 = vrot.slane %v93_v14, 1 }
   0x5   :  { %52 = vst [vmem:[#allocation0 + $0x38] sm:$0xff] %v51_v4  ;;  %v121_v22 = vld [vmem:[#allocation0 + $0x47] ss:$-1 sm:$0xff]  ;;  %v108_v24 = vrot.slane %v107_v16, 1  ;;  %v135_v28 = vld [vmem:[#allocation0 + $0x57] ss:$-1 sm:$0xff] }
   0x6   :  { %54 = vst [vmem:[#allocation0 + $0x48] sm:$0xff] %v53_v5  ;;  %v122_v29 = vrot.slane %v121_v22, 1  ;;  %v149_v32 = vld [vmem:[#allocation0 + $0x67] ss:$-1 sm:$0xff]  ;;  %v136_v33 = vrot.slane %v135_v28, 1 }
   0x7   :  { %56 = vst [vmem:[#allocation0 + $0x58] sm:$0xff] %v55_v7  ;;  %v163_v36 = vld [vmem:[#allocation0 + $0x77] ss:$-1 sm:$0xff]  ;;  %v150_v37 = vrot.slane %v149_v32, 1 }
   0x8   :  { %58 = vst [vmem:[#allocation0 + $0x68] sm:$0xff] %v57_v9  ;;  %v164_v40 = vrot.slane %v163_v36, 1 }
   0x9   :  { %60 = vst [vmem:[#allocation0 + $0x78] sm:$0xff] %v59_v11  ;;  %v70_v15 = vld [vmem:[#allocation0 + $0xf] ss:$-1 sm:$0xff] }
   0xa   :  { %67 = vst [vmem:[#allocation1] sm:$0xff] %v66_v12  ;;  %v71_v17 = vrot.slane %v70_v15, 1  ;;  %v84_v18 = vld [vmem:[#allocation0 + $0x1f] ss:$-1 sm:$0xff] }
   0xb   :  { %81 = vst [vmem:[#allocation1 + $0x8] sm:$0xff] %v80_v13  ;;  %v85_v20 = vrot.slane %v84_v18, 1  ;;  %v98_v21 = vld [vmem:[#allocation0 + $0x2f] ss:$-1 sm:$0xff] }
   0xc   :  { %75 = vst.msk [vmem:[#allocation1] sm:$0xff] %vm74_vm0, %v71_v17  ;;  %v99_v23 = vrot.slane %v98_v21, 1  ;;  %v112_v25 = vld [vmem:[#allocation0 + $0x3f] ss:$-1 sm:$0xff] }
   0xd   :  { %89 = vst.msk [vmem:[#allocation1 + $0x8] sm:$0xff] %vm74_vm0, %v85_v20  ;;  %v113_v26 = vrot.slane %v112_v25, 1  ;;  %v126_v27 = vld [vmem:[#allocation0 + $0x4f] ss:$-1 sm:$0xff] }
   0xe   :  { %95 = vst [vmem:[#allocation1 + $0x10] sm:$0xff] %v94_v19  ;;  %v140_v30 = vld [vmem:[#allocation0 + $0x5f] ss:$-1 sm:$0xff]  ;;  %v127_v31 = vrot.slane %v126_v27, 1 }
   0xf   :  { %103 = vst.msk [vmem:[#allocation1 + $0x10] sm:$0xff] %vm74_vm0, %v99_v23  ;;  %v154_v34 = vld [vmem:[#allocation0 + $0x6f] ss:$-1 sm:$0xff]  ;;  %v141_v35 = vrot.slane %v140_v30, 1 }
  0x10   :  { %109 = vst [vmem:[#allocation1 + $0x18] sm:$0xff] %v108_v24  ;;  %v168_v38 = vld [vmem:[#allocation0 + $0x7f] ss:$-1 sm:$0xff]  ;;  %v155_v39 = vrot.slane %v154_v34, 1 }
  0x11   :  { %117 = vst.msk [vmem:[#allocation1 + $0x18] sm:$0xff] %vm74_vm0, %v113_v26  ;;  %v169_v41 = vrot.slane %v168_v38, 1 }
  0x12   :  { %123 = vst [vmem:[#allocation1 + $0x20] sm:$0xff] %v122_v29 }
  0x13   :  { %131 = vst.msk [vmem:[#allocation1 + $0x20] sm:$0xff] %vm74_vm0, %v127_v31  ;;  %v216_v42 = vld [vmem:[#allocation1] sm:$0xff] }
  0x14   :  { %137 = vst [vmem:[#allocation1 + $0x28] sm:$0xff] %v136_v33  ;;  %v218_v43 = vld [vmem:[#allocation1 + $0x8] sm:$0xff] }
  0x15   :  { %145 = vst.msk [vmem:[#allocation1 + $0x28] sm:$0xff] %vm74_vm0, %v141_v35 }
  0x16   :  { %151 = vst [vmem:[#allocation1 + $0x30] sm:$0xff] %v150_v37  ;;  %v220_v44 = vld [vmem:[#allocation1 + $0x10] sm:$0xff] }
  0x17   :  { %159 = vst.msk [vmem:[#allocation1 + $0x30] sm:$0xff] %vm74_vm0, %v155_v39 }
  0x18   :  { %165 = vst [vmem:[#allocation1 + $0x38] sm:$0xff] %v164_v40  ;;  %v222_v45 = vld [vmem:[#allocation1 + $0x18] sm:$0xff] }
  0x19   :  { %173 = vst.msk [vmem:[#allocation1 + $0x38] sm:$0xff] %vm74_vm0, %v169_v41 }
  0x1a   :  { %217 = vst [vmem:[%s332_s1] sm:$0xff] %v216_v42  ;;  %v224_v46 = vld [vmem:[#allocation1 + $0x20] sm:$0xff] }
  0x1b   :  { %219 = vst [vmem:[%s332_s1 + $0x8] sm:$0xff] %v218_v43 }
  0x1c   :  { %221 = vst [vmem:[%s332_s1 + $0x10] sm:$0xff] %v220_v44  ;;  %v226_v47 = vld [vmem:[#allocation1 + $0x28] sm:$0xff] }
  0x1d   :  { %223 = vst [vmem:[%s332_s1 + $0x18] sm:$0xff] %v222_v45 }
  0x1e   :  { %225 = vst [vmem:[%s332_s1 + $0x20] sm:$0xff] %v224_v46  ;;  %v228_v48 = vld [vmem:[#allocation1 + $0x30] sm:$0xff] }
  0x1f   :  { %227 = vst [vmem:[%s332_s1 + $0x28] sm:$0xff] %v226_v47 }
  0x20   :  { %229 = vst [vmem:[%s332_s1 + $0x30] sm:$0xff] %v228_v48  ;;  %v230_v49 = vld [vmem:[#allocation1 + $0x38] sm:$0xff] }
  0x21   :  { %231 = vst [vmem:[%s332_s1 + $0x38] sm:$0xff] %v230_v49 }

// kernel: spectral_transform.7
= control target key start
LH: loop header
LB: loop body
LE: loop exit
PB: predicated region body
PF: predicated region fallthrough
CT: control target
= control target key end

     0   :  { %s614_s15 = smov 0   ;;  %s616_s16 = smov 0   ;;  %s686_s0 = inlined_call_operand.vmem [shape: f32[2,4,256], index: 0, kind: input, shape index: {}]   ;;  %s687_s1 = inlined_call_operand.vmem [shape: f32[2,4,256], index: 1, kind: input, shape index: {}]   ;;  %s688_s2 = inlined_call_operand.vmem [shape: f32[2,4,64], index: 2, kind: input, shape index: {}]   ;;  %s689_s3 = inlined_call_operand.vmem [shape: bf16[8,4], index: 3, kind: input, shape index: {}]   ;;  %s690_s4 = inlined_call_operand.vmem [shape: f32[2,8,256], index: 4, kind: output, shape index: {}]  }
   0x1   :  { %s618_s17 = smov 0   ;;  %s620_s18 = smov 0  }
   0x2   :  { %s622_s19 = smov 0  }
   0x3 LB: > { %s23_s20 = sadd.s32 1, %s571_s17  ;;  %s26_s21 = sadd.s32 1, %s575_s18  ;;  %s579_s19 = sphi %s622_s19, %s14_s19   ;;  %s575_s18 = sphi %s620_s18, %s694_s18   ;;  %s571_s17 = sphi %s618_s17, %s693_s17   ;;  %s567_s16 = sphi %s616_s16, %s692_s16   ;;  %s563_s15 = sphi %s614_s15, %s691_s15  }
   0x4   : > { %p24_p0 = scmp.ge.s32.totalorder %s23_s20, 2  ;;  %p482_p1 = scmp.ge.s32.totalorder %s579_s19, 1 }
   0x5   : > { %p205_p2 = scmp.lt.s32.totalorder %s579_s19, 5 }
   0x6   : > { %s696_s20 = smov (%p24_p0, %s23_s20), 0  ;;  %s698_s21 = smov (!%p24_p0, %s26_s21), %s575_s18 }
   0x7   : > { %p206_p3 = pnand %p482_p1, %p205_p2  ;;  %p28_p4 = scmp.ge.s32.totalorder %s698_s21, 2 }
   0x8   : > { %p249_p5 = scmp.lt.s32.totalorder (!%p206_p3), %s567_s16, 1  ;;  %s581_s26 = smov (!%p206_p3), 8  }
   0x9   : > { %s700_s21 = smov (%p28_p4, %s698_s21), 0  ;;  %209 = sbr.rel (%p206_p3) target bundleno = 296 (0x128), region = 36 }
   0xa   : > { %s582_s27 = smov (!%p206_p3), 24   ;;  %s583_s28 = smov (!%p206_p3), 40  }
   0xb   : > { %s584_s29 = smov (!%p206_p3), 16   ;;  %s585_s30 = smov (!%p206_p3), 32  }
   0xc   : > { %s586_s5 = smov (!%p206_p3), 48   ;;  %s587_s6 = smov (!%p206_p3), 56  }
   0xd   : > { %s588_s7 = smov (!%p206_p3), 64   ;;  %p251_p6 = scmp.lt.s32.totalorder (!%p206_p3), %s563_s15, 1 }
   0xe   : > { %s702_s16 = smov (!%p249_p5, %s567_s16), 1  ;;  %vm304_vm0 = vcmask 64512   ;;  %vm306_vm1 = vcmask 130048   ;;  %vm308_vm2 = vcmask 195584   ;;  %vm310_vm3 = vcmask 261120  }
   0xf   : > { %s487_s22 = sshll.u32 %s702_s16, 2  ;;  %s704_s15 = smov (!%p251_p6, %s563_s15), 1  ;;  %vm312_vm4 = vcmask 326656   ;;  %vm314_vm5 = vcmask 392192   ;;  %vm316_vm6 = vcmask 457728   ;;  %vm318_vm7 = vcmask 523264  }
  0x10   : > { %s268_s25 = scalar_lea.vmem %s688_s2, %s487_s22  ;;  %s483_s8 = sshll.u32 %s702_s16, 1  ;;  %vm320_vm8 = vcmask 588800   ;;  %vm322_vm9 = vcmask 654336   ;;  %vm324_vm10 = vcmask 719872   ;;  %vm326_vm11 = vcmask 785408  }
  0x11   : > { %v278_v0 = vld [vmem:[%s268_s25] sm:$0xf]  ;;  %s655_s9 = sadd.s32 %s483_s8, %s704_s15  ;;  %vm328_vm12 = vcmask 850944   ;;  %vm330_vm13 = vcmask 916480   ;;  %vm332_vm14 = vcmask 982016   ;;  %vm344_vm15 = vcmask 1041408  }
  0x12   : > { %280 = vrot.lane.b32.xlu0 %v278_v0, %s581_s26  ;;  %286 = vrot.lane.b32.xlu1 %v278_v0, %s582_s27  ;;  %s484_s10 = sshll.u32 %s655_s9, 2  ;;  %v338_v30 = vld [vmem:[%s689_s3] sm:$0xf]  ;;  %s489_s24 = sshll.u32 %s655_s9, 3 }
  0x13   : > { %292 = vrot.lane.b32.xlu2 %v278_v0, %s583_s28  ;;  %s256_s13 = scalar_lea.vmem %s686_s0, %s484_s10  ;;  %s264_s16 = scalar_lea.vmem %s687_s1, %s484_s10 }
  0x14   : > { %v334_v16 = vld [vmem:[%s256_s13] sm:$0xf]  ;;  %s276_s27 = scalar_lea.vmem %s690_s4, %s489_s24 }
  0x15   : > { %v335_v17 = vld [vmem:[%s264_s16] sm:$0xf] }
  0x16   : > { %v336_v23 = vadd.f32 %v335_v17, %v334_v16 }
  0x1a   : > { %283 = vrot.lane.b32.xlu0 %v278_v0, %s584_s29  ;;  %289 = vrot.lane.b32.xlu1 %v278_v0, %s585_s30 }
  0x1b   : > { %295 = vrot.lane.b32.xlu2 %v278_v0, %s586_s5 }
  0x22   : > { %298 = vrot.lane.b32.xlu0 %v278_v0, %s587_s6  ;;  %301 = vrot.lane.b32.xlu1 %v278_v0, %s588_s7 }
  0x6d   : > { %v293_v3 = vpop.permute.xlu2 %292 }
  0x75   : > { %v296_v14 = vpop.permute.xlu2 %295 }
  0x84   : > { %v281_v1 = vpop.permute.xlu0 %280  ;;  %v287_v2 = vpop.permute.xlu1 %286 }
  0x85   : > { %v305_v4 = vsel %vm304_vm0, %v278_v0, %v281_v1  ;;  %vm340_vm0 = vcmask 31744  }
  0x86   : > { %v307_v5 = vsel %vm306_vm1, %v305_v4, %v281_v1 }
  0x8c   : > { %v284_v6 = vpop.permute.xlu0 %283  ;;  %v290_v7 = vpop.permute.xlu1 %289 }
  0x8d   : > { %v309_v8 = vsel %vm308_vm2, %v307_v5, %v284_v6 }
  0x8e   : > { %v311_v9 = vsel %vm310_vm3, %v309_v8, %v284_v6 }
  0x8f   : > { %v313_v10 = vsel %vm312_vm4, %v311_v9, %v287_v2 }
  0x90   : > { %v315_v11 = vsel %vm314_vm5, %v313_v10, %v287_v2 }
  0x91   : > { %v317_v12 = vsel %vm316_vm6, %v315_v11, %v290_v7 }
  0x92   : > { %v319_v13 = vsel %vm318_vm7, %v317_v12, %v290_v7 }
  0x93   : > { %v321_v15 = vsel %vm320_vm8, %v319_v13, %v293_v3 }
  0x94   : > { %v323_v18 = vsel %vm322_vm9, %v321_v15, %v293_v3  ;;  %v299_v19 = vpop.permute.xlu0 %298  ;;  %v302_v22 = vpop.permute.xlu1 %301 }
  0x95   : > { %v325_v20 = vsel %vm324_vm10, %v323_v18, %v296_v14 }
  0x96   : > { %v327_v21 = vsel %vm326_vm11, %v325_v20, %v296_v14 }
  0x97   : > { %v329_v24 = vsel %vm328_vm12, %v327_v21, %v299_v19 }
  0x98   : > { %v331_v25 = vsel %vm330_vm13, %v329_v24, %v299_v19 }
  0x99   : > { %v333_v26 = vsel %vm332_vm14, %v331_v25, %v302_v22 }
  0x9a   : > { %v337_v27 = vadd.f32 %v336_v23, %v333_v26 }
  0x9c   : > { %v339_v28 = vpack.c.bf16 %v337_v27, %v337_v27 }
  0x9e   : > { %v346_v29 = vsel %vm344_vm15, %v339_v28, 0 }
  0x9f   : > { %355 = vmatpush.bf16.msra.mxu0 %v346_v29 }
  0xa2   : > { %490 = vmatmul.msk.bf16.vlgmr.msra.gmra.mxu0 %vm340_vm0, %v338_v30 }
 0x11f   : > { %v357_v31 = vpop.f32.mrf.mxu0 }
 0x120   : > { %361 = vst [vmem:[%s276_s27] sm:$0xff] %v357_v31 }
 0x127   : > { %v359_v32 = vpop.f32.mrf.mxu0 }
 0x128 PF: > { %s14_s19 = sadd.s32 1, %s579_s19   ;;  %s691_s15 = smov %s571_s17 }
 0x129   : > { %p11_p7 = scmp.ge.s32.totalorder %s14_s19, 6   ;;  %s692_s16 = smov %s575_s18 }
 0x12a   : > { %s693_s17 = smov %s696_s20  ;;  %s694_s18 = smov %s700_s21 }
 0x12b   :  { %13 = sbr.rel (!%p11_p7) target bundleno = 3 (0x3), region = 72 }

</bundles_post_ra>
